<compile_context>
chip_gen: v5e
topology: v5e:2x2
jax: 0.10.0
libtpu: 0.0.40
codegen_flags: <defaults>
</compile_context>

<pallas_src>
import functools

import jax
import jax.numpy as jnp
import numpy as np
from jax import lax
from jax.experimental import pallas as pl
from jax.experimental.pallas import tpu as pltpu

BN_EPS = 1e-5
MIN_LOGSIGMA = -10.0
MAX_LOGSIGMA = 10.0
_LANE = 128
_SUBLANE = 8
_VMEM_CAP_BYTES = 64 * 1024 * 1024   # v7x physical per-TC VMEM


def _round_up(n, m):
    return ((n + m - 1) // m) * m


def _pad2d(a, rows, cols):
    r, c = a.shape
    return jnp.pad(a, ((0, rows - r), (0, cols - c)))


def _pick_tb(Bpad, tb_max):
    """Largest multiple-of-8 divisor of Bpad <= tb_max that leaves a
    pipeline-deep grid: prefer >=8 steps with >=128-row tiles, then >=4 steps
    with >=64-row tiles, then whatever fits."""
    divisors = [d for d in range(_SUBLANE, min(Bpad, tb_max) + 1, _SUBLANE)
                if Bpad % d == 0]
    if not divisors:
        return Bpad
    for min_steps, min_rows in ((8, 128), (4, 64), (2, _SUBLANE), (1, _SUBLANE)):
        ok = [d for d in divisors if Bpad // d >= min_steps and d >= min_rows]
        if ok:
            return max(ok)
    return max(divisors)


# ----------------------------------------------------------------------------
# Kernel
# ----------------------------------------------------------------------------
def _encoder_kernel(n_hidden, compute_dtype, *refs):
    """refs = (x, W0, b0, ..., W_{nh-1}, b_{nh-1}, Whead, bhead, out)

    Every W already has the previous layer's eval-mode BatchNorm folded in;
    the last (W, b) pair is the fused [H, 2K_pad] mu|logsigma head.
    """
    x_ref = refs[0]
    out_ref = refs[-1]

    # Cast to the MXU compute dtype in-kernel (no padded HBM copy of x).
    h = x_ref[...].astype(compute_dtype)

    idx = 1
    for _ in range(n_hidden):
        W = refs[idx][...]
        b = refs[idx + 1][...]
        idx += 2
        # Linear (+ folded BN of previous layer): MXU matmul, f32 accumulation.
        acc = jnp.dot(h, W, preferred_element_type=jnp.float32) + b
        # ReLU in the compute dtype (bf16 VALU on v6e/v7x); exact vs f32 ReLU.
        h = jnp.maximum(acc.astype(compute_dtype), 0)
        # Dropout: identity in eval mode.  BatchNorm: folded into next matmul.

    Wh = refs[idx][...]
    bh = refs[idx + 1][...]
    out = jnp.dot(h, Wh, preferred_element_type=jnp.float32) + bh
    # logsigma clip is done on the tiny (B, K) slice in the wrapper.
    out_ref[...] = out.astype(out_ref.dtype)


# ----------------------------------------------------------------------------
# Parameter preparation (BN fold + head fusion + lane padding + bf16 cast)
# ----------------------------------------------------------------------------
def prepare_params(params, *, compute_dtype=jnp.bfloat16):
    """Fold eval-mode BatchNorm into the following Linear, fuse the mu/logsigma
    heads into one matmul, zero-pad every matmul OUTPUT dimension to a multiple
    of 128 lanes (the gene/input dim of W0 is left un-padded), and cast weights
    to the MXU compute dtype.  Do this ONCE per model."""
    n_hidden = len(params["W"])

    # BN affine terms (f32).
    scales, shifts = [], []
    for l in range(n_hidden):
        scale = params["gamma"][l] * lax.rsqrt(params["rvar"][l] + BN_EPS)
        shift = params["beta"][l] - params["rmean"][l] * scale
        scales.append(scale)          # [1, H_l]
        shifts.append(shift)          # [1, H_l]

    Ws, bs = [], []
    for l in range(n_hidden):
        W_orig = params["W"][l].astype(jnp.float32)   # [in, H_l]
        b = params["b"][l].astype(jnp.float32)        # [1, H_l]
        if l == 0:
            W = W_orig
        else:
            # next_linear(BN(y)) == y @ (scale^T * W) + (shift @ W + b)
            W = W_orig * scales[l - 1][0][:, None]
            b = b + shifts[l - 1] @ W_orig
        Ws.append(W)
        bs.append(b)

    # Fused head [H_last, 2K] with last hidden layer's BN folded in.
    Whead = jnp.concatenate([params["Wmu"], params["Wls"]], axis=1).astype(jnp.float32)
    bhead = jnp.concatenate([params["bmu"], params["bls"]], axis=1).astype(jnp.float32)
    Ws.append(Whead * scales[-1][0][:, None])
    bs.append(bhead + shifts[-1] @ Whead)
    K = params["Wmu"].shape[1]

    G = params["W"][0].shape[0]
    padded_Ws, padded_bs = [], []
    prev = G            # layer-0 contraction dim stays un-padded
    for W, b in zip(Ws, bs):
        out_pad = _round_up(W.shape[1], _LANE)
        padded_Ws.append(_pad2d(W, prev, out_pad).astype(compute_dtype))
        padded_bs.append(_pad2d(b, 1, out_pad).astype(jnp.float32))
        prev = out_pad

    return {
        "Ws": padded_Ws,
        "bs": padded_bs,
        "n_hidden": n_hidden,
        "K": K,
        "G": G,
        "out_pad": prev,              # padded fused-head width (>= 2K)
        "compute_dtype": compute_dtype,
    }


# ----------------------------------------------------------------------------
# Wrapper
# ----------------------------------------------------------------------------
def encoder_etm_forward(x, prepared, *, tb=256):
    """x: [B, G] expression matrix.  prepared: output of prepare_params()."""
    B, G = x.shape
    assert G == prepared["G"]
    out_pad = prepared["out_pad"]
    K = prepared["K"]
    n_hidden = prepared["n_hidden"]
    dt = prepared["compute_dtype"]
    Ws, bs = prepared["Ws"], prepared["bs"]

    # Pad the batch only to the 8-sublane granule (copies x only when ragged).
    Bpad = _round_up(B, _SUBLANE)
    if Bpad != B:
        x = jnp.pad(x, ((0, Bpad - B), (0, 0)))
    tb_eff = _pick_tb(Bpad, tb)
    grid = (Bpad // tb_eff,)

    inputs = [x]
    for W, b in zip(Ws, bs):
        inputs += [W, b]

    # Cost hint for the XLA scheduler.
    flops = sum(2 * Bpad * W.shape[0] * W.shape[1] for W in Ws)
    w_bytes = (sum(W.size * W.dtype.itemsize for W in Ws)
               + sum(b.size * b.dtype.itemsize for b in bs))
    bytes_accessed = (x.size * x.dtype.itemsize
                      + Bpad * out_pad * jnp.dtype(dt).itemsize
                      + w_bytes)

    def vmem_limit(w_bufs):
        need = (2 * tb_eff * G * x.dtype.itemsize              # x double-buffered
                + 2 * tb_eff * out_pad * jnp.dtype(dt).itemsize  # out double-buffered
                + w_bufs * w_bytes)                            # resident weights
        return int(min(_VMEM_CAP_BYTES, max(2 * need, 8 << 20)))

    kernel = functools.partial(_encoder_kernel, n_hidden, dt)

    def build(single_buffer_weights):
        def resident(shape):
            # Grid-invariant weights: DMA'd once; single-buffer to halve their
            # VMEM footprint (matters for large gene counts on v7x).
            if single_buffer_weights:
                return pl.BlockSpec(shape, lambda i: (0, 0),
                                    pipeline_mode=pl.Buffered(1))
            return pl.BlockSpec(shape, lambda i: (0, 0))

        in_specs = [pl.BlockSpec((tb_eff, G), lambda i: (i, 0))]
        for W, b in zip(Ws, bs):
            in_specs += [resident(W.shape), resident(b.shape)]

        return pl.pallas_call(
            kernel,
            out_shape=jax.ShapeDtypeStruct((Bpad, out_pad), dt),
            grid_spec=pltpu.PrefetchScalarGridSpec(
                num_scalar_prefetch=0,
                grid=grid,
                in_specs=in_specs,
                out_specs=pl.BlockSpec((tb_eff, out_pad), lambda i: (i, 0)),
            ),
            compiler_params=pltpu.CompilerParams(
                dimension_semantics=("parallel",),
                vmem_limit_bytes=vmem_limit(1 if single_buffer_weights else 2)),
            cost_estimate=pl.CostEstimate(
                flops=flops, transcendentals=0, bytes_accessed=bytes_accessed),
        )

    try:
        out = build(True)(*inputs)
    except Exception:
        # Fallback if this jax build rejects single-buffered (Buffered(1)) specs.
        out = build(False)(*inputs)

    mu = out[:B, :K].astype(jnp.float32)
    logsigma = jnp.clip(out[:B, K:2 * K].astype(jnp.float32),
                        MIN_LOGSIGMA, MAX_LOGSIGMA)
    return mu, logsigma


# ----------------------------------------------------------------------------
# Pure-JAX f32 reference of the same eval-mode forward (unfolded, unfused)
# ----------------------------------------------------------------------------
def encoder_etm_reference(x, params):
    h = x.astype(jnp.float32)
    for l in range(len(params["W"])):
        h = h @ params["W"][l] + params["b"][l]
        h = jnp.maximum(h, 0.0)
        h = ((h - params["rmean"][l]) * lax.rsqrt(params["rvar"][l] + BN_EPS)
             * params["gamma"][l] + params["beta"][l])
    mu = h @ params["Wmu"] + params["bmu"]
    ls = jnp.clip(h @ params["Wls"] + params["bls"], MIN_LOGSIGMA, MAX_LOGSIGMA)
    return mu, ls


def init_params(key, input_size, hidden_sizes, output_size):
    """Deterministic synthetic parameters (PyTorch-Linear-style uniform init)."""
    params = {"W": [], "b": [], "gamma": [], "beta": [], "rmean": [], "rvar": []}
    sizes = [input_size] + list(hidden_sizes)
    for l in range(len(hidden_sizes)):
        fan_in, fan_out = sizes[l], sizes[l + 1]
        bound = 1.0 / np.sqrt(fan_in)
        key, k1, k2, k3, k4, k5, k6 = jax.random.split(key, 7)
        params["W"].append(jax.random.uniform(k1, (fan_in, fan_out), jnp.float32,
                                              -bound, bound))
        params["b"].append(jax.random.uniform(k2, (1, fan_out), jnp.float32,
                                              -bound, bound))
        params["gamma"].append(jax.random.uniform(k3, (1, fan_out), jnp.float32,
                                                  0.5, 1.5))
        params["beta"].append(jax.random.uniform(k4, (1, fan_out), jnp.float32,
                                                 -0.1, 0.1))
        params["rmean"].append(jax.random.uniform(k5, (1, fan_out), jnp.float32,
                                                  -0.2, 0.2))
        params["rvar"].append(jax.random.uniform(k6, (1, fan_out), jnp.float32,
                                                 0.5, 1.5))
    hidden_dim = hidden_sizes[-1]
    bound = 1.0 / np.sqrt(hidden_dim)
    key, k1, k2, k3, k4 = jax.random.split(key, 5)
    params["Wmu"] = jax.random.uniform(k1, (hidden_dim, output_size), jnp.float32,
                                       -bound, bound)
    params["bmu"] = jax.random.uniform(k2, (1, output_size), jnp.float32,
                                       -bound, bound)
    params["Wls"] = jax.random.uniform(k3, (hidden_dim, output_size), jnp.float32,
                                       -bound, bound)
    params["bls"] = jax.random.uniform(k4, (1, output_size), jnp.float32,
                                       -bound, bound)
    return params


if __name__ == "__main__":
    # scETM-like small shapes, deliberately exercising the padding paths:
    # 512 cells, 300 "genes" (un-padded gene dim), hidden [128, 64] (64 pads to
    # 128 lanes), 16 topics (fused head 2K=32 pads to 128 lanes).
    # tb auto-picks 128 -> grid of 4 (>=2 pipelined steps per TensorCore).
    B, G = 512, 300
    hidden_sizes = [128, 64]
    K = 16

    key = jax.random.PRNGKey(0)
    key, kx, kp = jax.random.split(key, 3)
    x = jax.random.uniform(kx, (B, G), jnp.float32, 0.0, 4.0)  # nonneg expression
    params = init_params(kp, G, hidden_sizes, K)

    prepared = prepare_params(params)                    # one-time param prep
    mu, logsigma = encoder_etm_forward(x, prepared)
    mu, logsigma = jax.block_until_ready((mu, logsigma))

    mu_ref, ls_ref = encoder_etm_reference(x, params)
    # bf16 MXU inputs + bf16 output (f32 accumulation) -> loosened tolerance.
    np.testing.assert_allclose(np.asarray(mu), np.asarray(mu_ref),
                               rtol=5e-2, atol=7e-2)
    np.testing.assert_allclose(np.asarray(logsigma), np.asarray(ls_ref),
                               rtol=5e-2, atol=7e-2)
    assert mu.shape == (B, K) and logsigma.shape == (B, K)

    print("KERNEL_OK")
</pallas_src>

<mosaic_0001>
module attributes {stable_mosaic.version = 11 : i64} {
  func.func @_encoder_kernel(%arg0: i32, %arg1: memref<128x300xf32, #tpu.memory_space<vmem>>, %arg2: memref<300x128xbf16, #tpu.memory_space<vmem>>, %arg3: memref<1x128xf32, #tpu.memory_space<vmem>>, %arg4: memref<128x128xbf16, #tpu.memory_space<vmem>>, %arg5: memref<1x128xf32, #tpu.memory_space<vmem>>, %arg6: memref<128x128xbf16, #tpu.memory_space<vmem>>, %arg7: memref<1x128xf32, #tpu.memory_space<vmem>>, %arg8: memref<128x128xbf16, #tpu.memory_space<vmem>>) attributes {dimension_semantics = [#tpu.dimension_semantics<parallel>], iteration_bounds = array<i64: 4>, scalar_prefetch = 0 : i64, scratch_operands = 0 : i64, tpu.core_type = #tpu.core_type<tc>, window_params = [{transform_indices = @transform_0, window_bounds = array<i64: 128, 300>}, {pipeline_mode = #tpu.pipeline_mode<synchronous>, transform_indices = @transform_1, window_bounds = array<i64: 300, 128>}, {pipeline_mode = #tpu.pipeline_mode<synchronous>, transform_indices = @transform_2, window_bounds = array<i64: 1, 128>}, {pipeline_mode = #tpu.pipeline_mode<synchronous>, transform_indices = @transform_3, window_bounds = array<i64: 128, 128>}, {pipeline_mode = #tpu.pipeline_mode<synchronous>, transform_indices = @transform_4, window_bounds = array<i64: 1, 128>}, {pipeline_mode = #tpu.pipeline_mode<synchronous>, transform_indices = @transform_5, window_bounds = array<i64: 128, 128>}, {pipeline_mode = #tpu.pipeline_mode<synchronous>, transform_indices = @transform_6, window_bounds = array<i64: 1, 128>}, {transform_indices = @transform_7, window_bounds = array<i64: 128, 128>}]} {
    %c0 = arith.constant 0 : index
    %c0_0 = arith.constant 0 : index
    %0 = vector.load %arg1[%c0, %c0_0] : memref<128x300xf32, #tpu.memory_space<vmem>>, vector<128x300xf32>
    %1 = arith.truncf %0 : vector<128x300xf32> to vector<128x300xbf16>
    %c0_1 = arith.constant 0 : index
    %c0_2 = arith.constant 0 : index
    %2 = vector.load %arg2[%c0_1, %c0_2] : memref<300x128xbf16, #tpu.memory_space<vmem>>, vector<300x128xbf16>
    %c0_3 = arith.constant 0 : index
    %c0_4 = arith.constant 0 : index
    %3 = vector.load %arg3[%c0_3, %c0_4] : memref<1x128xf32, #tpu.memory_space<vmem>>, vector<1x128xf32>
    %cst = arith.constant dense<0.000000e+00> : vector<128x128xf32>
    %4 = tpu.matmul %1, %2, %cst {dimension_numbers = #tpu.dot_dimension_numbers<[1], [0], [0], [1], [0, 0, 1, 1], [], []>} : vector<128x300xbf16>, vector<300x128xbf16>, vector<128x128xf32> -> vector<128x128xf32>
    %5 = vector.broadcast %3 : vector<1x128xf32> to vector<128x128xf32>
    %6 = arith.addf %4, %5 : vector<128x128xf32>
    %7 = arith.truncf %6 : vector<128x128xf32> to vector<128x128xbf16>
    %cst_5 = arith.constant 0.000000e+00 : bf16
    %8 = vector.broadcast %cst_5 : bf16 to vector<128x128xbf16>
    %9 = arith.maximumf %7, %8 : vector<128x128xbf16>
    %c0_6 = arith.constant 0 : index
    %c0_7 = arith.constant 0 : index
    %10 = vector.load %arg4[%c0_6, %c0_7] : memref<128x128xbf16, #tpu.memory_space<vmem>>, vector<128x128xbf16>
    %c0_8 = arith.constant 0 : index
    %c0_9 = arith.constant 0 : index
    %11 = vector.load %arg5[%c0_8, %c0_9] : memref<1x128xf32, #tpu.memory_space<vmem>>, vector<1x128xf32>
    %cst_10 = arith.constant dense<0.000000e+00> : vector<128x128xf32>
    %12 = tpu.matmul %9, %10, %cst_10 {dimension_numbers = #tpu.dot_dimension_numbers<[1], [0], [0], [1], [0, 0, 1, 1], [], []>} : vector<128x128xbf16>, vector<128x128xbf16>, vector<128x128xf32> -> vector<128x128xf32>
    %13 = vector.broadcast %11 : vector<1x128xf32> to vector<128x128xf32>
    %14 = arith.addf %12, %13 : vector<128x128xf32>
    %15 = arith.truncf %14 : vector<128x128xf32> to vector<128x128xbf16>
    %cst_11 = arith.constant 0.000000e+00 : bf16
    %16 = vector.broadcast %cst_11 : bf16 to vector<128x128xbf16>
    %17 = arith.maximumf %15, %16 : vector<128x128xbf16>
    %c0_12 = arith.constant 0 : index
    %c0_13 = arith.constant 0 : index
    %18 = vector.load %arg6[%c0_12, %c0_13] : memref<128x128xbf16, #tpu.memory_space<vmem>>, vector<128x128xbf16>
    %c0_14 = arith.constant 0 : index
    %c0_15 = arith.constant 0 : index
    %19 = vector.load %arg7[%c0_14, %c0_15] : memref<1x128xf32, #tpu.memory_space<vmem>>, vector<1x128xf32>
    %cst_16 = arith.constant dense<0.000000e+00> : vector<128x128xf32>
    %20 = tpu.matmul %17, %18, %cst_16 {dimension_numbers = #tpu.dot_dimension_numbers<[1], [0], [0], [1], [0, 0, 1, 1], [], []>} : vector<128x128xbf16>, vector<128x128xbf16>, vector<128x128xf32> -> vector<128x128xf32>
    %21 = vector.broadcast %19 : vector<1x128xf32> to vector<128x128xf32>
    %22 = arith.addf %20, %21 : vector<128x128xf32>
    %23 = arith.truncf %22 : vector<128x128xf32> to vector<128x128xbf16>
    %c0_17 = arith.constant 0 : index
    %c0_18 = arith.constant 0 : index
    %24 = vector.load %arg8[%c0_17, %c0_18] : memref<128x128xbf16, #tpu.memory_space<vmem>>, vector<128x128xbf16>
    tpu.vector_store %arg8[%c0_17, %c0_18], %23 {strides = array<i32>} : memref<128x128xbf16, #tpu.memory_space<vmem>>, vector<128x128xbf16>,
    return
  }
  func.func @transform_0(%arg0: i32) -> (i32, i32) {
    %c0_i32 = arith.constant 0 : i32
    %c0_i32_0 = arith.constant 0 : i32
    return %arg0, %c0_i32 : i32, i32
  }
  func.func @transform_1(%arg0: i32) -> (i32, i32) {
    %c0_i32 = arith.constant 0 : i32
    %c0_i32_0 = arith.constant 0 : i32
    %c0_i32_1 = arith.constant 0 : i32
    return %c0_i32, %c0_i32_0 : i32, i32
  }
  func.func @transform_2(%arg0: i32) -> (i32, i32) {
    %c0_i32 = arith.constant 0 : i32
    %c0_i32_0 = arith.constant 0 : i32
    %c0_i32_1 = arith.constant 0 : i32
    return %c0_i32, %c0_i32_0 : i32, i32
  }
  func.func @transform_3(%arg0: i32) -> (i32, i32) {
    %c0_i32 = arith.constant 0 : i32
    %c0_i32_0 = arith.constant 0 : i32
    %c0_i32_1 = arith.constant 0 : i32
    return %c0_i32, %c0_i32_0 : i32, i32
  }
  func.func @transform_4(%arg0: i32) -> (i32, i32) {
    %c0_i32 = arith.constant 0 : i32
    %c0_i32_0 = arith.constant 0 : i32
    %c0_i32_1 = arith.constant 0 : i32
    return %c0_i32, %c0_i32_0 : i32, i32
  }
  func.func @transform_5(%arg0: i32) -> (i32, i32) {
    %c0_i32 = arith.constant 0 : i32
    %c0_i32_0 = arith.constant 0 : i32
    %c0_i32_1 = arith.constant 0 : i32
    return %c0_i32, %c0_i32_0 : i32, i32
  }
  func.func @transform_6(%arg0: i32) -> (i32, i32) {
    %c0_i32 = arith.constant 0 : i32
    %c0_i32_0 = arith.constant 0 : i32
    %c0_i32_1 = arith.constant 0 : i32
    return %c0_i32, %c0_i32_0 : i32, i32
  }
  func.func @transform_7(%arg0: i32) -> (i32, i32) {
    %c0_i32 = arith.constant 0 : i32
    %c0_i32_0 = arith.constant 0 : i32
    return %arg0, %c0_i32 : i32, i32
  }
}

module attributes {stable_mosaic.version = 11 : i64} {
  func.func @_encoder_kernel(%arg0: i32, %arg1: memref<128x300xf32, #tpu.memory_space<vmem>>, %arg2: memref<300x128xbf16, #tpu.memory_space<vmem>>, %arg3: memref<1x128xf32, #tpu.memory_space<vmem>>, %arg4: memref<128x128xbf16, #tpu.memory_space<vmem>>, %arg5: memref<1x128xf32, #tpu.memory_space<vmem>>, %arg6: memref<128x128xbf16, #tpu.memory_space<vmem>>, %arg7: memref<1x128xf32, #tpu.memory_space<vmem>>, %arg8: memref<128x128xbf16, #tpu.memory_space<vmem>>) attributes {dimension_semantics = [#tpu.dimension_semantics<parallel>], iteration_bounds = array<i64: 4>, scalar_prefetch = 0 : i64, scratch_operands = 0 : i64, tpu.core_type = #tpu.core_type<tc>, window_params = [{transform_indices = @transform_0, window_bounds = array<i64: 128, 300>}, {pipeline_mode = #tpu.pipeline_mode<synchronous>, transform_indices = @transform_1, window_bounds = array<i64: 300, 128>}, {pipeline_mode = #tpu.pipeline_mode<synchronous>, transform_indices = @transform_2, window_bounds = array<i64: 1, 128>}, {pipeline_mode = #tpu.pipeline_mode<synchronous>, transform_indices = @transform_3, window_bounds = array<i64: 128, 128>}, {pipeline_mode = #tpu.pipeline_mode<synchronous>, transform_indices = @transform_4, window_bounds = array<i64: 1, 128>}, {pipeline_mode = #tpu.pipeline_mode<synchronous>, transform_indices = @transform_5, window_bounds = array<i64: 128, 128>}, {pipeline_mode = #tpu.pipeline_mode<synchronous>, transform_indices = @transform_6, window_bounds = array<i64: 1, 128>}, {transform_indices = @transform_7, window_bounds = array<i64: 128, 128>}]} {
    %c0 = arith.constant 0 : index
    %c0_0 = arith.constant 0 : index
    %0 = vector.load %arg1[%c0, %c0_0] : memref<128x300xf32, #tpu.memory_space<vmem>>, vector<128x300xf32>
    %1 = arith.truncf %0 : vector<128x300xf32> to vector<128x300xbf16>
    %c0_1 = arith.constant 0 : index
    %c0_2 = arith.constant 0 : index
    %2 = vector.load %arg2[%c0_1, %c0_2] : memref<300x128xbf16, #tpu.memory_space<vmem>>, vector<300x128xbf16>
    %c0_3 = arith.constant 0 : index
    %c0_4 = arith.constant 0 : index
    %3 = vector.load %arg3[%c0_3, %c0_4] : memref<1x128xf32, #tpu.memory_space<vmem>>, vector<1x128xf32>
    %cst = arith.constant dense<0.000000e+00> : vector<128x128xf32>
    %4 = tpu.matmul %1, %2, %cst {dimension_numbers = #tpu.dot_dimension_numbers<[1], [0], [0], [1], [0, 0, 1, 1], [], []>} : vector<128x300xbf16>, vector<300x128xbf16>, vector<128x128xf32> -> vector<128x128xf32>
    %5 = vector.broadcast %3 : vector<1x128xf32> to vector<128x128xf32>
    %6 = arith.addf %4, %5 : vector<128x128xf32>
    %7 = arith.truncf %6 : vector<128x128xf32> to vector<128x128xbf16>
    %cst_5 = arith.constant 0.000000e+00 : bf16
    %8 = vector.broadcast %cst_5 : bf16 to vector<128x128xbf16>
    %9 = arith.maximumf %7, %8 : vector<128x128xbf16>
    %c0_6 = arith.constant 0 : index
    %c0_7 = arith.constant 0 : index
    %10 = vector.load %arg4[%c0_6, %c0_7] : memref<128x128xbf16, #tpu.memory_space<vmem>>, vector<128x128xbf16>
    %c0_8 = arith.constant 0 : index
    %c0_9 = arith.constant 0 : index
    %11 = vector.load %arg5[%c0_8, %c0_9] : memref<1x128xf32, #tpu.memory_space<vmem>>, vector<1x128xf32>
    %cst_10 = arith.constant dense<0.000000e+00> : vector<128x128xf32>
    %12 = tpu.matmul %9, %10, %cst_10 {dimension_numbers = #tpu.dot_dimension_numbers<[1], [0], [0], [1], [0, 0, 1, 1], [], []>} : vector<128x128xbf16>, vector<128x128xbf16>, vector<128x128xf32> -> vector<128x128xf32>
    %13 = vector.broadcast %11 : vector<1x128xf32> to vector<128x128xf32>
    %14 = arith.addf %12, %13 : vector<128x128xf32>
    %15 = arith.truncf %14 : vector<128x128xf32> to vector<128x128xbf16>
    %cst_11 = arith.constant 0.000000e+00 : bf16
    %16 = vector.broadcast %cst_11 : bf16 to vector<128x128xbf16>
    %17 = arith.maximumf %15, %16 : vector<128x128xbf16>
    %c0_12 = arith.constant 0 : index
    %c0_13 = arith.constant 0 : index
    %18 = vector.load %arg6[%c0_12, %c0_13] : memref<128x128xbf16, #tpu.memory_space<vmem>>, vector<128x128xbf16>
    %c0_14 = arith.constant 0 : index
    %c0_15 = arith.constant 0 : index
    %19 = vector.load %arg7[%c0_14, %c0_15] : memref<1x128xf32, #tpu.memory_space<vmem>>, vector<1x128xf32>
    %cst_16 = arith.constant dense<0.000000e+00> : vector<128x128xf32>
    %20 = tpu.matmul %17, %18, %cst_16 {dimension_numbers = #tpu.dot_dimension_numbers<[1], [0], [0], [1], [0, 0, 1, 1], [], []>} : vector<128x128xbf16>, vector<128x128xbf16>, vector<128x128xf32> -> vector<128x128xf32>
    %21 = vector.broadcast %19 : vector<1x128xf32> to vector<128x128xf32>
    %22 = arith.addf %20, %21 : vector<128x128xf32>
    %23 = arith.truncf %22 : vector<128x128xf32> to vector<128x128xbf16>
    %c0_17 = arith.constant 0 : index
    %c0_18 = arith.constant 0 : index
    %24 = vector.load %arg8[%c0_17, %c0_18] : memref<128x128xbf16, #tpu.memory_space<vmem>>, vector<128x128xbf16>
    tpu.vector_store %arg8[%c0_17, %c0_18], %23 {strides = array<i32>} : memref<128x128xbf16, #tpu.memory_space<vmem>>, vector<128x128xbf16>,
    return
  }
  func.func @transform_0(%arg0: i32) -> (i32, i32) {
    %c0_i32 = arith.constant 0 : i32
    %c0_i32_0 = arith.constant 0 : i32
    return %arg0, %c0_i32 : i32, i32
  }
  func.func @transform_1(%arg0: i32) -> (i32, i32) {
    %c0_i32 = arith.constant 0 : i32
    %c0_i32_0 = arith.constant 0 : i32
    %c0_i32_1 = arith.constant 0 : i32
    return %c0_i32, %c0_i32_0 : i32, i32
  }
  func.func @transform_2(%arg0: i32) -> (i32, i32) {
    %c0_i32 = arith.constant 0 : i32
    %c0_i32_0 = arith.constant 0 : i32
    %c0_i32_1 = arith.constant 0 : i32
    return %c0_i32, %c0_i32_0 : i32, i32
  }
  func.func @transform_3(%arg0: i32) -> (i32, i32) {
    %c0_i32 = arith.constant 0 : i32
    %c0_i32_0 = arith.constant 0 : i32
    %c0_i32_1 = arith.constant 0 : i32
    return %c0_i32, %c0_i32_0 : i32, i32
  }
  func.func @transform_4(%arg0: i32) -> (i32, i32) {
    %c0_i32 = arith.constant 0 : i32
    %c0_i32_0 = arith.constant 0 : i32
    %c0_i32_1 = arith.constant 0 : i32
    return %c0_i32, %c0_i32_0 : i32, i32
  }
  func.func @transform_5(%arg0: i32) -> (i32, i32) {
    %c0_i32 = arith.constant 0 : i32
    %c0_i32_0 = arith.constant 0 : i32
    %c0_i32_1 = arith.constant 0 : i32
    return %c0_i32, %c0_i32_0 : i32, i32
  }
  func.func @transform_6(%arg0: i32) -> (i32, i32) {
    %c0_i32 = arith.constant 0 : i32
    %c0_i32_0 = arith.constant 0 : i32
    %c0_i32_1 = arith.constant 0 : i32
    return %c0_i32, %c0_i32_0 : i32, i32
  }
  func.func @transform_7(%arg0: i32) -> (i32, i32) {
    %c0_i32 = arith.constant 0 : i32
    %c0_i32_0 = arith.constant 0 : i32
    return %arg0, %c0_i32 : i32, i32
  }
}

</mosaic_0001>

<bundles_post_ra>
// kernel: tpu_custom_call.1
= control target key start
LH: loop header
LB: loop body
LE: loop exit
PB: predicated region body
PF: predicated region fallthrough
CT: control target
= control target key end

     0   :  { %12 = vsyncpa [#allocation3], 0  ;;  %s1875_s0 = inlined_call_operand.vmem [shape: f32[512,300], index: 0, kind: input, shape index: {}]   ;;  %s1876_s1 = inlined_call_operand.vmem [shape: bf16[300,128], index: 1, kind: input, shape index: {}]   ;;  %s1877_s2 = inlined_call_operand.vmem [shape: f32[1,128], index: 2, kind: input, shape index: {}]   ;;  %s1878_s3 = inlined_call_operand.vmem [shape: bf16[128,128], index: 3, kind: input, shape index: {}]   ;;  %s1879_s4 = inlined_call_operand.vmem [shape: f32[1,128], index: 4, kind: input, shape index: {}]   ;;  %s1880_s5 = inlined_call_operand.vmem [shape: bf16[128,128], index: 5, kind: input, shape index: {}]   ;;  %s1881_s6 = inlined_call_operand.vmem [shape: f32[1,128], index: 6, kind: input, shape index: {}]   ;;  %s1882_s7 = inlined_call_operand.hbm [shape: bf16[512,128], index: 7, kind: output, shape index: {}]  }
   0x1   :  { %14 = vsyncpa [#allocation3 + $0x1], 0  ;;  %s1556_s24 = smov 0   ;;  %s1558_s25 = smov 0  }
   0x2   :  { %s1560_s26 = smov 0   ;;  %s1562_s27 = smov 0  }
   0x3 LB: > { %s1577_s28 = sadd.s32 4294967295, %s1512_s27   ;;  %s1143_s29 = sadd.s32 4294967294, %s1512_s27   ;;  %s1512_s27 = sphi %s1562_s27, %s1888_s27   ;;  %s1508_s26 = sphi %s1560_s26, %s1887_s26   ;;  %s1504_s25 = sphi %s1558_s25, %s1886_s25   ;;  %s1500_s24 = sphi %s1556_s24, %s1885_s24  }
   0x4   : > { %s1581_s30 = sadd.s32 1, %s1512_s27   ;;  %s179_s8 = sadd.s32 1, %s1508_s26 }
   0x5   : > { %s176_s9 = ssub.s32 %s1512_s27, %s1581_s30  ;;  %p189_p0 = scmp.ne.s32.totalorder %s1508_s26, %s1504_s25 }
   0x6   : > { %p177_p1 = scmp.eq.s32.totalorder %s176_s9, 0  ;;  %p190_p2 = scmp.eq.s32.totalorder %s1577_s28, 3 }
   0x7   : > { %p195_p3 = scmp.ne.s32.totalorder %s1504_s25, %s1500_s24  ;;  %p196_p4 = scmp.eq.s32.totalorder %s1143_s29, 3 }
   0x8   : > { %s1592_s10 = scalar_select %p177_p1, %s1508_s26, %s179_s8  }
   0x9   : > { %p1594_p5 = por %p190_p2, %p189_p0  ;;  %p1598_p6 = por %p196_p4, %p195_p3 }
   0xa   : > { %p1146_p7 = scmp.ge.s32.totalorder %s1512_s27, 1  ;;  %p242_p8 = scmp.lt.s32.totalorder %s1512_s27, 5 }
   0xc   : > { %p243_p9 = pnand %p1146_p7, %p242_p8 }
   0xd   : > { %s1148_s23 = sshll.u32 (!%p243_p9), %s1577_s28, 4  ;;  %s272_s8 = sand.u32 (!%p243_p9), 1, %s1504_s25  }
   0xe   : > { %246 = sbr.rel (%p243_p9) target bundleno = 677 (0x2a5), region = 48  ;;  %p276_p10 = scmp.lt.s32.totalorder (!%p243_p9), %s1148_s23, 63 }
   0xf   : > { %s1147_s14 = sshll.u32 (!%p243_p9), %s272_s8, 6  ;;  %s1066_s29 = scalar_lea.sflag (!%p243_p9), [#allocation3], %s272_s8 }
  0x10   : > { %s1831_s15 = scalar_lea.vmem (!%p243_p9), [#allocation2], %s1147_s14  ;;  %s1470_s13 = scalar_lea.hbm (!%p243_p9), %s1882_s7, 256 }
  0x11   : > { %s1078_s20 = sshll.u32 (!%p243_p9), %s1831_s15, 4  ;;  %s1079_s20 = int_to_ptr.vmem [resolvable:$true] %s1078_s20 }
  0x13   : > { %v1310_v0 = vld [vmem:[%s1876_s1 + $0x38] sm:$0xff]  ;;  %v1309_v1 = vld [vmem:[%s1876_s1 + $0x30] sm:$0xff]  ;;  %vm536_vm0 = vcmask 1045504   ;;  %v1308_v5 = vld [vmem:[%s1876_s1 + $0x28] sm:$0xff]  ;;  %s1890_s23 = smov (!%p276_p10, %s1148_s23), 63  ;;  %vm511_vm1 = vcmask 359424  }
  0x14   : > { %540 = vmatpush.bf16.msra.mxu0 %v1310_v0  ;;  %1386 = vmatpush.bf16.msra.mxu1 %v1310_v0  ;;  %v1224_v2 = vld [vmem:[%s1876_s1 + $0x90] sm:$0xf]  ;;  %v1321_v3 = vld [vmem:[%s1876_s1 + $0x90] sm:$0x30]  ;;  %v1307_v7 = vld [vmem:[%s1876_s1 + $0x20] sm:$0xff]  ;;  %s1405_s16 = smul.u32 24, %s1890_s23 }
  0x15   : > { %1387 = vmatpush.bf16.msra.mxu3 %v1310_v0  ;;  %v1225_v4 = vor.u32 %v1321_v3, %v1224_v2  ;;  %v1306_v8 = vld [vmem:[%s1876_s1 + $0x18] sm:$0xff]  ;;  %v1305_v9 = vld [vmem:[%s1876_s1 + $0x10] sm:$0xff]  ;;  %v1304_v10 = vld [vmem:[%s1876_s1 + $0x8] sm:$0xff] }
  0x16   : > { %s1635_s21 = scalar_lea.vmem %s1875_s0, %s1405_s16  ;;  %v1320_v11 = vld [vmem:[%s1876_s1 + $0x88] sm:$0xff]  ;;  %v1303_v12 = vld [vmem:[%s1876_s1] sm:$0xff]  ;;  %v1318_v17 = vld [vmem:[%s1876_s1 + $0x78] sm:$0xff]  ;;  %s1338_s16 = sshll.u32 %s1577_s28, 6 }
  0x17   : > { %v538_v6 = vsel %vm536_vm0, %v1225_v4, 0  ;;  %v284_v13 = vld [vmem:[%s1635_s21] sm:$0xff]  ;;  %v287_v14 = vld [vmem:[%s1635_s21 + $0x18] sm:$0xff]  ;;  %v314_v15 = vld [vmem:[%s1635_s21 + $0xf0] sm:$0xff]  ;;  %s1077_s19 = scalar_lea.hbm %s1882_s7, %s1338_s16 }
  0x18   : > { %541 = vmatpush.bf16.msra.mxu0 %v1309_v1  ;;  %1388 = vmatpush.bf16.msra.mxu1 %v1309_v1  ;;  %v317_v16 = vld [vmem:[%s1635_s21 + $0x108] sm:$0xff]  ;;  %v332_v18 = vpack.c.bf16 %v287_v14, %v284_v13  ;;  %v1317_v20 = vld [vmem:[%s1876_s1 + $0x70] sm:$0xff]  ;;  %v1315_v22 = vld [vmem:[%s1876_s1 + $0x60] sm:$0xff]  ;;  %s1080_s22 = sshll.u32 %s1077_s19, 4  ;;  %s1081_s22 = int_to_ptr.hbm [resolvable:$true] %s1080_s22 }
  0x19   : > { %1402 = vmatpush.bf16.msra.mxu2 %v538_v6  ;;  %1389 = vmatpush.bf16.msra.mxu3 %v1309_v1  ;;  %v347_v19 = vpack.c.bf16 %v317_v16, %v314_v15  ;;  %v1316_v21 = vld [vmem:[%s1876_s1 + $0x68] sm:$0xff]  ;;  %v290_v23 = vld [vmem:[%s1635_s21 + $0x30] sm:$0xff]  ;;  %v320_v25 = vld [vmem:[%s1635_s21 + $0x120] sm:$0xff] }
  0x1a   : > { %v293_v24 = vld [vmem:[%s1635_s21 + $0x48] sm:$0xff]  ;;  %v323_v26 = vld [vmem:[%s1635_s21 + $0x138] sm:$0xff]  ;;  %v1313_v30 = vld [vmem:[%s1876_s1 + $0x50] sm:$0xff] }
  0x1b   : > { %v1314_v27 = vld [vmem:[%s1876_s1 + $0x58] sm:$0xff]  ;;  %v335_v28 = vpack.c.bf16 %v293_v24, %v290_v23  ;;  %v350_v29 = vpack.c.bf16 %v323_v26, %v320_v25  ;;  %v1319_v31 = vld [vmem:[%s1876_s1 + $0x80] sm:$0xff]  ;;  %v1312_v32 = vld [vmem:[%s1876_s1 + $0x48] sm:$0xff] }
  0x1c   : > { %542 = vmatpush.bf16.msra.mxu0 %v1308_v5  ;;  %1390 = vmatpush.bf16.msra.mxu1 %v1308_v5  ;;  %v1311_v33 = vld [vmem:[%s1876_s1 + $0x40] sm:$0xff]  ;;  %v299_v35 = vld [vmem:[%s1635_s21 + $0x78] sm:$0xff]  ;;  %v285_v36 = vld [vmem:[%s1635_s21 + $0x8] sm:$0xff] }
  0x1d   : > { %1391 = vmatpush.bf16.msra.mxu3 %v1308_v5  ;;  %1403 = vmatpush.bf16.msra.mxu2 %v1320_v11  ;;  %v296_v34 = vld [vmem:[%s1635_s21 + $0x60] sm:$0xff]  ;;  %v302_v40 = vld [vmem:[%s1635_s21 + $0x90] sm:$0xff]  ;;  %v305_v41 = vld [vmem:[%s1635_s21 + $0xa8] sm:$0xff] }
  0x1e   : > { %v288_v37 = vld [vmem:[%s1635_s21 + $0x20] sm:$0xff]  ;;  %v338_v38 = vpack.c.bf16 %v299_v35, %v296_v34  ;;  %v291_v42 = vld [vmem:[%s1635_s21 + $0x38] sm:$0xff]  ;;  %v294_v43 = vld [vmem:[%s1635_s21 + $0x50] sm:$0xff]  ;;  %v341_v44 = vpack.c.bf16 %v305_v41, %v302_v40 }
  0x1f   : > { %v333_v39 = vpack.c.bf16 %v288_v37, %v285_v36  ;;  %v336_v45 = vpack.c.bf16 %v294_v43, %v291_v42  ;;  %v308_v46 = vld [vmem:[%s1635_s21 + $0xc0] sm:$0xff]  ;;  %v311_v47 = vld [vmem:[%s1635_s21 + $0xd8] sm:$0xff]  ;;  %v297_v48 = vld [vmem:[%s1635_s21 + $0x68] sm:$0xff] }
  0x20   : > { %543 = vmatpush.bf16.msra.mxu0 %v1307_v7  ;;  %1392 = vmatpush.bf16.msra.mxu1 %v1307_v7  ;;  %v300_v49 = vld [vmem:[%s1635_s21 + $0x80] sm:$0xff]  ;;  %v344_v50 = vpack.c.bf16 %v311_v47, %v308_v46  ;;  %v319_v53 = vld [vmem:[%s1635_s21 + $0x118] sm:$0xff]  ;;  %v306_v56 = vld [vmem:[%s1635_s21 + $0xb0] sm:$0xff] }
  0x21   : > { %1393 = vmatpush.bf16.msra.mxu3 %v1307_v7  ;;  %1404 = vmatpush.bf16.msra.mxu2 %v1319_v31  ;;  %v339_v51 = vpack.c.bf16 %v300_v49, %v297_v48  ;;  %v316_v52 = vld [vmem:[%s1635_s21 + $0x100] sm:$0xff]  ;;  %v303_v55 = vld [vmem:[%s1635_s21 + $0x98] sm:$0xff]  ;;  %v286_v57 = vld [vmem:[%s1635_s21 + $0x10] sm:$0xff] }
  0x22   : > { %v349_v54 = vpack.c.bf16 %v319_v53, %v316_v52  ;;  %v289_v58 = vld [vmem:[%s1635_s21 + $0x28] sm:$0xff]  ;;  %v342_v59 = vpack.c.bf16 %v306_v56, %v303_v55  ;;  %v322_v61 = vld [vmem:[%s1635_s21 + $0x130] sm:$0xff]  ;;  %v312_v1 = vld [vmem:[%s1635_s21 + $0xe0] sm:$0xff] }
  0x23   : > { %v334_v60 = vpack.c.bf16 %v289_v58, %v286_v57  ;;  %v325_v62 = vld [vmem:[%s1635_s21 + $0x148] sm:$0xff]  ;;  %v292_v2 = vld [vmem:[%s1635_s21 + $0x40] sm:$0xff]  ;;  %v295_v3 = vld [vmem:[%s1635_s21 + $0x58] sm:$0xff] }
  0x24   : > { %544 = vmatpush.bf16.msra.mxu0 %v1306_v8  ;;  %1394 = vmatpush.bf16.msra.mxu1 %v1306_v8  ;;  %v352_v63 = vpack.c.bf16 %v325_v62, %v322_v61  ;;  %v309_v0 = vld [vmem:[%s1635_s21 + $0xc8] sm:$0xff]  ;;  %v337_v5 = vpack.c.bf16 %v295_v3, %v292_v2  ;;  %v318_v7 = vld [vmem:[%s1635_s21 + $0x110] sm:$0xff]  ;;  %v324_v13 = vld [vmem:[%s1635_s21 + $0x140] sm:$0xff] }
  0x25   : > { %1395 = vmatpush.bf16.msra.mxu3 %v1306_v8  ;;  %1231 = vmatmul.msk.bf16.vlgmr.msra.gmra.mxu2 %vm511_vm1, %v349_v54  ;;  %v345_v4 = vpack.c.bf16 %v312_v1, %v309_v0  ;;  %v298_v8 = vld [vmem:[%s1635_s21 + $0x70] sm:$0xff]  ;;  %v304_v14 = vld [vmem:[%s1635_s21 + $0xa0] sm:$0xff]  ;;  %v307_v15 = vld [vmem:[%s1635_s21 + $0xb8] sm:$0xff] }
  0x26   : > { %v313_v23 = vld [vmem:[%s1635_s21 + $0xe8] sm:$0xff]  ;;  %v326_v24 = vld [vmem:[%s1635_s21 + $0x150] sm:$0xff]  ;;  %v1325_v46 = vld [vmem:[%s1878_s3 + $0x18] sm:$0xff] }
  0x27   : > { %v329_v25 = vld [vmem:[%s1635_s21 + $0x168] sm:$0xff]  ;;  %v330_v34 = vld [vmem:[%s1635_s21 + $0x170] sm:$0xff]  ;;  %v1322_v53 = vld [vmem:[%s1878_s3] sm:$0xff] }
  0x28   : > { %545 = vmatpush.bf16.msra.mxu0 %v1305_v9  ;;  %1396 = vmatpush.bf16.msra.mxu1 %v1305_v9  ;;  %v1328_v41 = vld [vmem:[%s1878_s3 + $0x30] sm:$0xff]  ;;  %v1327_v42 = vld [vmem:[%s1878_s3 + $0x28] sm:$0xff]  ;;  %v1769_v58 = vld [vmem:[%s1877_s2] ss:$0 sm:$0xff] }
  0x29   : > { %1397 = vmatpush.bf16.msra.mxu3 %v1305_v9  ;;  %v301_v9 = vld [vmem:[%s1635_s21 + $0x88] sm:$0xff]  ;;  %v1324_v49 = vld [vmem:[%s1878_s3 + $0x10] sm:$0xff] }
  0x2c   : > { %546 = vmatpush.bf16.msra.mxu0 %v1304_v10  ;;  %1398 = vmatpush.bf16.msra.mxu1 %v1304_v10 }
  0x2d   : > { %1399 = vmatpush.bf16.msra.mxu3 %v1304_v10 }
  0x30   : > { %547 = vmatpush.bf16.msra.mxu0 %v1303_v12  ;;  %1400 = vmatpush.bf16.msra.mxu1 %v1303_v12 }
  0x31   : > { %1401 = vmatpush.bf16.msra.mxu3 %v1303_v12  ;;  %v321_v12 = vld [vmem:[%s1635_s21 + $0x128] sm:$0xff] }
  0x32   : > { %v351_v16 = vpack.c.bf16 %v324_v13, %v321_v12 }
  0x33   : > { %548 = vmatmul.bf16.vlgmr.msra.gmra.mxu0 %v332_v18  ;;  %573 = vmatmul.bf16.vlgmr.msra.gmra.mxu1 %v347_v19 }
  0x34   : > { %643 = vmatpush.bf16.msrb.mxu0 %v538_v6  ;;  %589 = vmatpush.bf16.msrb.mxu1 %v1318_v17  ;;  %v315_v6 = vld [vmem:[%s1635_s21 + $0xf8] sm:$0xff]  ;;  %v343_v17 = vpack.c.bf16 %v307_v15, %v304_v14 }
  0x35   : > { %1232 = vmatmul.msk.bf16.gmra.mxu2 %vm511_vm1, %v352_v63  ;;  %v348_v10 = vpack.c.bf16 %v318_v7, %v315_v6 }
  0x38   : > { %590 = vmatpush.bf16.msrb.mxu1 %v1317_v20  ;;  %644 = vmatpush.bf16.msrb.mxu0 %v1320_v11  ;;  %v340_v11 = vpack.c.bf16 %v301_v9, %v298_v8 }
  0x3c   : > { %591 = vmatpush.bf16.msrb.mxu1 %v1316_v21  ;;  %645 = vmatpush.bf16.msrb.mxu0 %v1319_v31  ;;  %v331_v31 = vld [vmem:[%s1635_s21 + $0x178] sm:$0xff] }
  0x40   : > { %592 = vmatpush.bf16.msrb.mxu1 %v1315_v22  ;;  %v310_v22 = vld [vmem:[%s1635_s21 + $0xd0] sm:$0xff] }
  0x41   : > { %v346_v26 = vpack.c.bf16 %v313_v23, %v310_v22 }
  0x43   : > { %553 = vmatmul.bf16.gmra.mxu0 %v335_v28  ;;  %578 = vmatmul.bf16.gmra.mxu1 %v350_v29 }
  0x44   : > { %593 = vmatpush.bf16.msrb.mxu1 %v1314_v27  ;;  %v353_v27 = vpack.c.bf16 %v329_v25, %v326_v24 }
  0x46   : > { %583 = vmatmul.bf16.vlgmr.msra.gmra.mxu3 %v353_v27 }
  0x48   : > { %594 = vmatpush.bf16.msrb.mxu1 %v1313_v30  ;;  %v328_v30 = vld [vmem:[%s1635_s21 + $0x160] sm:$0xff] }
  0x4c   : > { %595 = vmatpush.bf16.msrb.mxu1 %v1312_v32  ;;  %v355_v32 = vpack.c.bf16 %v331_v31, %v328_v30 }
  0x4e   : > { %1233 = vmatmul.msk.bf16.gmra.mxu2 %vm511_vm1, %v355_v32 }
  0x50   : > { %596 = vmatpush.bf16.msrb.mxu1 %v1311_v33  ;;  %v327_v33 = vld [vmem:[%s1635_s21 + $0x158] sm:$0xff]  ;;  %s1464_s21 = sshra.s32 %s1081_s22, 4  ;;  %s1465_s21 = int_to_ptr.hbm [resolvable:$true] %s1464_s21 }
  0x51   : > { %v354_v35 = vpack.c.bf16 %v330_v34, %v327_v33  ;;  %s1466_s23 = scalar_lea.hbm %s1465_s21, 64  ;;  %p1471_p0 = scmp.lt.s32.totalorder %s1465_s21, %s1882_s7 }
  0x52   : > { %p1467_p11 = scmp.ne.s32.totalorder %s1465_s21, %s1466_s23  ;;  %p1472_p1 = scmp.lt.s32.totalorder %s1470_s13, %s1466_s23 }
  0x53   : > { %558 = vmatmul.bf16.gmra.mxu0 %v338_v38  ;;  %597 = vmatmul.bf16.vlgmr.msrb.gmra.mxu1 %v333_v39  ;;  %v1329_v38 = vld [vmem:[%s1878_s3 + $0x38] sm:$0xff] }
  0x54   : > { %811 = vmatpush.bf16.msrb.mxu3 %v1329_v38  ;;  %p1468_p12 = pnand %p1467_p11, %p1594_p5  ;;  %p1473_p2 = por %p1472_p1, %p1471_p0 }
  0x56   : > { %p1469_p13 = pneg %p1468_p12 }
  0x58   : > { %812 = vmatpush.bf16.msrb.mxu3 %v1328_v41  ;;  %p1474_p3 = pnand %p1473_p2, %p1469_p13 }
  0x5c   : > { %813 = vmatpush.bf16.msrb.mxu3 %v1327_v42 }
  0x63   : > { %563 = vmatmul.bf16.gmra.mxu0 %v341_v44  ;;  %602 = vmatmul.bf16.gmra.mxu1 %v336_v45  ;;  %v1326_v45 = vld [vmem:[%s1878_s3 + $0x20] sm:$0xff] }
  0x64   : > { %814 = vmatpush.bf16.msrb.mxu3 %v1326_v45 }
  0x68   : > { %815 = vmatpush.bf16.msrb.mxu3 %v1325_v46 }
  0x6c   : > { %816 = vmatpush.bf16.msrb.mxu3 %v1324_v49 }
  0x73   : > { %568 = vmatmul.bf16.gmra.mxu0 %v344_v50  ;;  %607 = vmatmul.bf16.gmra.mxu1 %v339_v51  ;;  %v1323_v50 = vld [vmem:[%s1878_s3 + $0x8] sm:$0xff] }
  0x74   : > { %817 = vmatpush.bf16.msrb.mxu3 %v1323_v50 }
  0x78   : > { %818 = vmatpush.bf16.msrb.mxu3 %v1322_v53 }
  0x83   : > { %612 = vmatmul.bf16.gmra.mxu1 %v342_v59  ;;  %1226 = vmatmul.msk.bf16.vlgmr.msrb.gmra.mxu0 %vm511_vm1, %v334_v60 }
  0x93   : > { %617 = vmatmul.bf16.gmra.mxu1 %v345_v4  ;;  %1227 = vmatmul.msk.bf16.gmra.mxu0 %vm511_vm1, %v337_v5 }
  0xa3   : > { %622 = vmatmul.bf16.gmra.mxu1 %v348_v10  ;;  %1228 = vmatmul.msk.bf16.gmra.mxu0 %vm511_vm1, %v340_v11 }
  0xb0   : > { %v549_v18 = vpop.f32.mrf.mxu0  ;;  %v1715_v19 = vpop.f32.mrf.mxu1 }
  0xb1   : > { %v550_v61 = vadd.f32 %v1769_v58, %v549_v18  ;;  %v672_v18 = vpop.f32.mrf.mxu2 }
  0xb3   : > { %627 = vmatmul.bf16.gmra.mxu1 %v351_v16  ;;  %1229 = vmatmul.msk.bf16.gmra.mxu0 %vm511_vm1, %v343_v17 }
  0xb8   : > { %v551_v20 = vpop.f32.mrf.mxu0  ;;  %v1718_v21 = vpop.f32.mrf.mxu1 }
  0xb9   : > { %v552_v62 = vadd.f32 %v1769_v58, %v551_v20  ;;  %v577_v33 = vadd.f32 %v1769_v58, %v1718_v21 }
  0xc0   : > { %v554_v28 = vpop.f32.mrf.mxu0  ;;  %v1724_v29 = vpop.f32.mrf.mxu1 }
  0xc1   : > { %v555_v10 = vadd.f32 %v1769_v58, %v554_v28  ;;  %v674_v28 = vpop.f32.mrf.mxu2  ;;  %v580_v21 = vadd.f32 %v1769_v58, %v1724_v29 }
  0xc3   : > { %1230 = vmatmul.msk.bf16.gmra.mxu0 %vm511_vm1, %v346_v26  ;;  %632 = vmatmul.bf16.gmra.mxu1 %v354_v35  ;;  %v575_v26 = vadd.f32 %v1769_v58, %v1715_v19 }
  0xc8   : > { %v556_v36 = vpop.f32.mrf.mxu0  ;;  %v1732_v37 = vpop.f32.mrf.mxu1 }
  0xc9   : > { %v557_v11 = vadd.f32 %v1769_v58, %v556_v36  ;;  %v677_v49 = vpop.f32.mrf.mxu2 }
  0xd0   : > { %v559_v39 = vpop.f32.mrf.mxu0  ;;  %v598_v40 = vpop.f32.mrf.mxu1 }
  0xd1   : > { %v599_v63 = vadd.f32 %v598_v40, %v550_v61  ;;  %v560_v27 = vadd.f32 %v1769_v58, %v559_v39  ;;  %v582_v61 = vadd.f32 %v1769_v58, %v1732_v37 }
  0xd8   : > { %v561_v43 = vpop.f32.mrf.mxu0  ;;  %v600_v44 = vpop.f32.mrf.mxu1 }
  0xd9   : > { %v601_v0 = vadd.f32 %v600_v44, %v552_v62  ;;  %v562_v30 = vadd.f32 %v1769_v58, %v561_v43 }
  0xe0   : > { %v1749_v47 = vpop.f32.mrf.mxu0  ;;  %v603_v48 = vpop.f32.mrf.mxu1 }
  0xe1   : > { %v604_v12 = vadd.f32 %v603_v48, %v555_v10  ;;  %v565_v53 = vadd.f32 %v1769_v58, %v1749_v47 }
  0xe8   : > { %v1757_v51 = vpop.f32.mrf.mxu0  ;;  %v605_v52 = vpop.f32.mrf.mxu1 }
  0xe9   : > { %v606_v13 = vadd.f32 %v605_v52, %v557_v11 }
  0xf0   : > { %v1762_v54 = vpop.f32.mrf.mxu0  ;;  %v608_v55 = vpop.f32.mrf.mxu1 }
  0xf1   : > { %v609_v31 = vadd.f32 %v608_v55, %v560_v27  ;;  %v567_v55 = vadd.f32 %v1769_v58, %v1757_v51  ;;  %v570_v37 = vadd.f32 %v1769_v58, %v1762_v54  ;;  %v1336_v54 = vld [vmem:[%s1880_s5 + $0x30] sm:$0xff] }
  0xf8   : > { %v1764_v56 = vpop.f32.mrf.mxu0  ;;  %v610_v57 = vpop.f32.mrf.mxu1 }
  0xf9   : > { %v611_v34 = vadd.f32 %v610_v57, %v562_v30 }
 0x100   : > { %v613_v59 = vpop.f32.mrf.mxu1  ;;  %v647_v60 = vpop.f32.mrf.mxu0 }
 0x101   : > { %v648_v1 = vadd.f32 %v647_v60, %v599_v63  ;;  %v614_v57 = vadd.f32 %v613_v59, %v565_v53 }
 0x103   : > { %v719_v5 = vmax.f32 %v648_v1, 0.0 }
 0x108   : > { %v615_v2 = vpop.f32.mrf.mxu1  ;;  %v649_v3 = vpop.f32.mrf.mxu0 }
 0x109   : > { %v650_v4 = vadd.f32 %v649_v3, %v601_v0  ;;  %v616_v62 = vadd.f32 %v615_v2, %v567_v55  ;;  %v679_v0 = vpop.f32.mrf.mxu2  ;;  %v572_v2 = vadd.f32 %v1769_v58, %v1764_v56  ;;  %v1335_v56 = vld [vmem:[%s1880_s5 + $0x28] sm:$0xff] }
 0x10b   : > { %v720_v6 = vmax.f32 %v650_v4, 0.0 }
 0x10d   : > { %v735_v7 = vpack.c.bf16 %v720_v6, %v719_v5 }
 0x10f   : > { %819 = vmatmul.bf16.vlgmr.msrb.gmra.mxu3 %v735_v7 }
 0x110   : > { %v1773_v8 = vpop.f32.mrf.mxu1  ;;  %v652_v9 = vpop.f32.mrf.mxu0 }
 0x111   : > { %v653_v14 = vadd.f32 %v652_v9, %v604_v12  ;;  %v619_v12 = vadd.f32 %v1773_v8, %v570_v37  ;;  %v1334_v8 = vld [vmem:[%s1880_s5 + $0x20] sm:$0xff]  ;;  %v682_v27 = vpop.f32.mrf.mxu2 }
 0x113   : > { %v721_v20 = vmax.f32 %v653_v14, 0.0 }
 0x118   : > { %v620_v15 = vpop.f32.mrf.mxu1  ;;  %v654_v16 = vpop.f32.mrf.mxu0 }
 0x119   : > { %v655_v17 = vadd.f32 %v654_v16, %v606_v13  ;;  %v621_v13 = vadd.f32 %v620_v15, %v572_v2  ;;  %v584_v15 = vpop.f32.mrf.mxu3 }
 0x11a   : > { %v585_v30 = vadd.f32 %v1769_v58, %v584_v15 }
 0x11b   : > { %v722_v22 = vmax.f32 %v655_v17, 0.0 }
 0x11d   : > { %v736_v23 = vpack.c.bf16 %v722_v22, %v721_v20 }
 0x11f   : > { %824 = vmatmul.bf16.gmra.mxu3 %v736_v23  ;;  %v1337_v23 = vld [vmem:[%s1880_s5 + $0x38] sm:$0xff] }
 0x120   : > { %v623_v24 = vpop.f32.mrf.mxu1  ;;  %v657_v25 = vpop.f32.mrf.mxu0  ;;  %984 = vmatpush.bf16.msrb.mxu2 %v1337_v23 }
 0x121   : > { %v624_v32 = vadd.f32 %v623_v24, %v575_v26  ;;  %v658_v35 = vadd.f32 %v657_v25, %v609_v31  ;;  %v1333_v24 = vld [vmem:[%s1880_s5 + $0x18] sm:$0xff]  ;;  %v1332_v26 = vld [vmem:[%s1880_s5 + $0x10] sm:$0xff] }
 0x123   : > { %v673_v40 = vadd.f32 %v672_v18, %v624_v32  ;;  %v723_v44 = vmax.f32 %v658_v35, 0.0  ;;  %v684_v35 = vpop.f32.mrf.mxu2 }
 0x124   : > { %985 = vmatpush.bf16.msrb.mxu2 %v1336_v54 }
 0x125   : > { %v729_v46 = vmax.f32 %v673_v40, 0.0  ;;  %v1331_v40 = vld [vmem:[%s1880_s5 + $0x8] sm:$0xff] }
 0x128   : > { %v625_v36 = vpop.f32.mrf.mxu1  ;;  %v659_v38 = vpop.f32.mrf.mxu0  ;;  %986 = vmatpush.bf16.msrb.mxu2 %v1335_v56 }
 0x129   : > { %v626_v41 = vadd.f32 %v625_v36, %v577_v33  ;;  %v660_v42 = vadd.f32 %v659_v38, %v611_v34 }
 0x12b   : > { %v724_v45 = vmax.f32 %v660_v42, 0.0  ;;  %v675_v19 = vadd.f32 %v674_v28, %v626_v41  ;;  %v586_v28 = vpop.f32.mrf.mxu3 }
 0x12c   : > { %987 = vmatpush.bf16.msrb.mxu2 %v1334_v8  ;;  %v587_v31 = vadd.f32 %v1769_v58, %v586_v28 }
 0x12d   : > { %v730_v39 = vmax.f32 %v675_v19, 0.0  ;;  %v737_v48 = vpack.c.bf16 %v724_v45, %v723_v44  ;;  %v1330_v44 = vld [vmem:[%s1880_s5] sm:$0xff] }
 0x12e   : > { %v1448_v19 = vld [vmem:[%s1879_s4] ss:$0 sm:$0xff] }
 0x12f   : > { %829 = vmatmul.bf16.gmra.mxu3 %v737_v48  ;;  %v740_v43 = vpack.c.bf16 %v730_v39, %v729_v46 }
 0x130   : > { %v628_v50 = vpop.f32.mrf.mxu1  ;;  %v662_v52 = vpop.f32.mrf.mxu0  ;;  %988 = vmatpush.bf16.msrb.mxu2 %v1333_v24 }
 0x131   : > { %v629_v60 = vadd.f32 %v628_v50, %v580_v21  ;;  %v663_v63 = vadd.f32 %v662_v52, %v614_v57 }
 0x133   : > { %v678_v4 = vadd.f32 %v677_v49, %v629_v60  ;;  %v725_v29 = vmax.f32 %v663_v63, 0.0 }
 0x134   : > { %989 = vmatpush.bf16.msrb.mxu2 %v1332_v26 }
 0x135   : > { %v731_v47 = vmax.f32 %v678_v4, 0.0 }
 0x138   : > { %v630_v1 = vpop.f32.mrf.mxu1  ;;  %v664_v3 = vpop.f32.mrf.mxu0  ;;  %990 = vmatpush.bf16.msrb.mxu2 %v1331_v40 }
 0x139   : > { %v631_v5 = vadd.f32 %v630_v1, %v582_v61  ;;  %v665_v6 = vadd.f32 %v664_v3, %v616_v62 }
 0x13b   : > { %v726_v7 = vmax.f32 %v665_v6, 0.0  ;;  %v680_v9 = vadd.f32 %v679_v0, %v631_v5 }
 0x13c   : > { %991 = vmatpush.bf16.msrb.mxu2 %v1330_v44 }
 0x13d   : > { %v732_v10 = vmax.f32 %v680_v9, 0.0  ;;  %v738_v11 = vpack.c.bf16 %v726_v7, %v725_v29 }
 0x13f   : > { %834 = vmatmul.bf16.gmra.mxu3 %v738_v11  ;;  %v741_v51 = vpack.c.bf16 %v732_v10, %v731_v47 }
 0x140   : > { %v667_v59 = vpop.f32.mrf.mxu0  ;;  %v633_v25 = vpop.f32.mrf.mxu1 }
 0x141   : > { %v668_v14 = vadd.f32 %v667_v59, %v619_v12  ;;  %v634_v33 = vadd.f32 %v633_v25, %v585_v30 }
 0x143   : > { %v727_v18 = vmax.f32 %v668_v14, 0.0  ;;  %v683_v36 = vadd.f32 %v682_v27, %v634_v33 }
 0x145   : > { %v733_v41 = vmax.f32 %v683_v36, 0.0 }
 0x148   : > { %v669_v16 = vpop.f32.mrf.mxu0  ;;  %v635_v32 = vpop.f32.mrf.mxu1 }
 0x149   : > { %v670_v17 = vadd.f32 %v669_v16, %v621_v13  ;;  %v636_v34 = vadd.f32 %v635_v32, %v587_v31 }
 0x14b   : > { %v728_v20 = vmax.f32 %v670_v17, 0.0  ;;  %v685_v38 = vadd.f32 %v684_v35, %v636_v34 }
 0x14d   : > { %v739_v22 = vpack.c.bf16 %v728_v20, %v727_v18  ;;  %v734_v42 = vmax.f32 %v685_v38, 0.0  ;;  %v1449_v38 = vld [vmem:[%s1881_s6] ss:$0 sm:$0xff] }
 0x14f   : > { %839 = vmatmul.bf16.gmra.mxu3 %v739_v22  ;;  %v742_v45 = vpack.c.bf16 %v734_v42, %v733_v41 }
 0x15f   : > { %844 = vmatmul.bf16.gmra.mxu3 %v740_v43 }
 0x16f   : > { %849 = vmatmul.bf16.gmra.mxu3 %v741_v51 }
 0x17f   : > { %854 = vmatmul.bf16.gmra.mxu3 %v742_v45 }
 0x192   : > { %v820_v58 = vpop.f32.mrf.mxu3 }
 0x193   : > { %v821_v46 = vadd.f32 %v1448_v19, %v820_v58 }
 0x195   : > { %v892_v49 = vmax.f32 %v821_v46, 0.0 }
 0x19a   : > { %v822_v39 = vpop.f32.mrf.mxu3 }
 0x19b   : > { %v823_v48 = vadd.f32 %v1448_v19, %v822_v39 }
 0x19d   : > { %v893_v43 = vmax.f32 %v823_v48, 0.0 }
 0x19f   : > { %v908_v50 = vpack.c.bf16 %v893_v43, %v892_v49 }
 0x1a1   : > { %992 = vmatmul.bf16.vlgmr.msrb.gmra.mxu2 %v908_v50 }
 0x1a2   : > { %v825_v52 = vpop.f32.mrf.mxu3 }
 0x1a3   : > { %v826_v21 = vadd.f32 %v1448_v19, %v825_v52 }
 0x1a5   : > { %v894_v57 = vmax.f32 %v826_v21, 0.0 }
 0x1aa   : > { %v827_v53 = vpop.f32.mrf.mxu3 }
 0x1ab   : > { %v828_v55 = vadd.f32 %v1448_v19, %v827_v53 }
 0x1ad   : > { %v895_v60 = vmax.f32 %v828_v55, 0.0 }
 0x1af   : > { %v909_v61 = vpack.c.bf16 %v895_v60, %v894_v57 }
 0x1b1   : > { %997 = vmatmul.bf16.gmra.mxu2 %v909_v61 }
 0x1b2   : > { %v830_v62 = vpop.f32.mrf.mxu3 }
 0x1b3   : > { %v831_v63 = vadd.f32 %v1448_v19, %v830_v62 }
 0x1b5   : > { %v896_v3 = vmax.f32 %v831_v63, 0.0 }
 0x1ba   : > { %v832_v0 = vpop.f32.mrf.mxu3 }
 0x1bb   : > { %v833_v1 = vadd.f32 %v1448_v19, %v832_v0 }
 0x1bd   : > { %v897_v4 = vmax.f32 %v833_v1, 0.0 }
 0x1bf   : > { %v910_v5 = vpack.c.bf16 %v897_v4, %v896_v3 }
 0x1c1   : > { %1002 = vmatmul.bf16.gmra.mxu2 %v910_v5 }
 0x1c2   : > { %v835_v6 = vpop.f32.mrf.mxu3 }
 0x1c3   : > { %v836_v29 = vadd.f32 %v1448_v19, %v835_v6 }
 0x1c5   : > { %v898_v47 = vmax.f32 %v836_v29, 0.0 }
 0x1ca   : > { %v837_v7 = vpop.f32.mrf.mxu3 }
 0x1cb   : > { %v838_v9 = vadd.f32 %v1448_v19, %v837_v7 }
 0x1cd   : > { %v899_v10 = vmax.f32 %v838_v9, 0.0 }
 0x1cf   : > { %v911_v11 = vpack.c.bf16 %v899_v10, %v898_v47 }
 0x1d1   : > { %1007 = vmatmul.bf16.gmra.mxu2 %v911_v11 }
 0x1d2   : > { %v840_v51 = vpop.f32.mrf.mxu3 }
 0x1d3   : > { %v841_v59 = vadd.f32 %v1448_v19, %v840_v51 }
 0x1d5   : > { %v900_v12 = vmax.f32 %v841_v59, 0.0 }
 0x1da   : > { %v842_v37 = vpop.f32.mrf.mxu3 }
 0x1db   : > { %v843_v2 = vadd.f32 %v1448_v19, %v842_v37 }
 0x1dd   : > { %v901_v13 = vmax.f32 %v843_v2, 0.0 }
 0x1df   : > { %v912_v14 = vpack.c.bf16 %v901_v13, %v900_v12 }
 0x1e1   : > { %1012 = vmatmul.bf16.gmra.mxu2 %v912_v14 }
 0x1e2   : > { %v845_v16 = vpop.f32.mrf.mxu3 }
 0x1e3   : > { %v846_v17 = vadd.f32 %v1448_v19, %v845_v16 }
 0x1e5   : > { %v902_v22 = vmax.f32 %v846_v17, 0.0 }
 0x1ea   : > { %v847_v18 = vpop.f32.mrf.mxu3 }
 0x1eb   : > { %v848_v20 = vadd.f32 %v1448_v19, %v847_v18 }
 0x1ed   : > { %v903_v23 = vmax.f32 %v848_v20, 0.0 }
 0x1ef   : > { %v913_v54 = vpack.c.bf16 %v903_v23, %v902_v22 }
 0x1f1   : > { %1017 = vmatmul.bf16.gmra.mxu2 %v913_v54 }
 0x1f2   : > { %v850_v56 = vpop.f32.mrf.mxu3 }
 0x1f3   : > { %v851_v8 = vadd.f32 %v1448_v19, %v850_v56 }
 0x1f5   : > { %v904_v25 = vmax.f32 %v851_v8, 0.0 }
 0x1fa   : > { %v852_v15 = vpop.f32.mrf.mxu3 }
 0x1fb   : > { %v853_v24 = vadd.f32 %v1448_v19, %v852_v15 }
 0x1fd   : > { %v905_v26 = vmax.f32 %v853_v24, 0.0 }
 0x1ff   : > { %v914_v27 = vpack.c.bf16 %v905_v26, %v904_v25 }
 0x201   : > { %1022 = vmatmul.bf16.gmra.mxu2 %v914_v27 }
 0x202   : > { %v855_v28 = vpop.f32.mrf.mxu3 }
 0x203   : > { %v856_v30 = vadd.f32 %v1448_v19, %v855_v28 }
 0x205   : > { %v906_v33 = vmax.f32 %v856_v30, 0.0 }
 0x20a   : > { %v857_v31 = vpop.f32.mrf.mxu3 }
 0x20b   : > { %v858_v32 = vadd.f32 %v1448_v19, %v857_v31 }
 0x20d   : > { %v907_v34 = vmax.f32 %v858_v32, 0.0 }
 0x20f   : > { %v915_v35 = vpack.c.bf16 %v907_v34, %v906_v33 }
 0x211   : > { %1027 = vmatmul.bf16.gmra.mxu2 %v915_v35 }
 0x224   : > { %v993_v36 = vpop.f32.mrf.mxu2 }
 0x225   : > { %v994_v41 = vadd.f32 %v1449_v38, %v993_v36 }
 0x22c   : > { %v995_v40 = vpop.f32.mrf.mxu2 }
 0x22d   : > { %v996_v42 = vadd.f32 %v1449_v38, %v995_v40 }
 0x22f   : > { %v1342_v44 = vpack.c.bf16 %v996_v42, %v994_v41 }
 0x231   : > { %1343 = vst [vmem:[%s1831_s15] sm:$0xff] %v1342_v44  }
 0x234   : > { %v998_v45 = vpop.f32.mrf.mxu2 }
 0x235   : > { %v999_v19 = vadd.f32 %v1449_v38, %v998_v45 }
 0x23c   : > { %v1000_v58 = vpop.f32.mrf.mxu2 }
 0x23d   : > { %v1001_v46 = vadd.f32 %v1449_v38, %v1000_v58 }
 0x23f   : > { %v1347_v39 = vpack.c.bf16 %v1001_v46, %v999_v19 }
 0x241   : > { %1379 = vst [vmem:[%s1831_s15 + $0x8] sm:$0xff] %v1347_v39  }
 0x244   : > { %v1003_v48 = vpop.f32.mrf.mxu2 }
 0x245   : > { %v1004_v43 = vadd.f32 %v1449_v38, %v1003_v48 }
 0x24c   : > { %v1005_v49 = vpop.f32.mrf.mxu2 }
 0x24d   : > { %v1006_v50 = vadd.f32 %v1449_v38, %v1005_v49 }
 0x24f   : > { %v1352_v52 = vpack.c.bf16 %v1006_v50, %v1004_v43 }
 0x251   : > { %1380 = vst [vmem:[%s1831_s15 + $0x10] sm:$0xff] %v1352_v52  }
 0x254   : > { %v1008_v21 = vpop.f32.mrf.mxu2 }
 0x255   : > { %v1009_v55 = vadd.f32 %v1449_v38, %v1008_v21 }
 0x25c   : > { %v1010_v53 = vpop.f32.mrf.mxu2 }
 0x25d   : > { %v1011_v57 = vadd.f32 %v1449_v38, %v1010_v53 }
 0x25f   : > { %v1357_v60 = vpack.c.bf16 %v1011_v57, %v1009_v55 }
 0x261   : > { %1381 = vst [vmem:[%s1831_s15 + $0x18] sm:$0xff] %v1357_v60  }
 0x264   : > { %v1013_v61 = vpop.f32.mrf.mxu2 }
 0x265   : > { %v1014_v63 = vadd.f32 %v1449_v38, %v1013_v61 }
 0x26c   : > { %v1015_v62 = vpop.f32.mrf.mxu2 }
 0x26d   : > { %v1016_v0 = vadd.f32 %v1449_v38, %v1015_v62 }
 0x26f   : > { %v1362_v1 = vpack.c.bf16 %v1016_v0, %v1014_v63 }
 0x271   : > { %1382 = vst [vmem:[%s1831_s15 + $0x20] sm:$0xff] %v1362_v1  }
 0x274   : > { %v1018_v3 = vpop.f32.mrf.mxu2 }
 0x275   : > { %v1019_v5 = vadd.f32 %v1449_v38, %v1018_v3 }
 0x27c   : > { %v1020_v4 = vpop.f32.mrf.mxu2 }
 0x27d   : > { %v1021_v6 = vadd.f32 %v1449_v38, %v1020_v4 }
 0x27f   : > { %v1367_v29 = vpack.c.bf16 %v1021_v6, %v1019_v5 }
 0x281   : > { %1383 = vst [vmem:[%s1831_s15 + $0x28] sm:$0xff] %v1367_v29  }
 0x284   : > { %v1023_v7 = vpop.f32.mrf.mxu2 }
 0x285   : > { %v1024_v47 = vadd.f32 %v1449_v38, %v1023_v7 }
 0x28c   : > { %v1025_v9 = vpop.f32.mrf.mxu2 }
 0x28d   : > { %v1026_v10 = vadd.f32 %v1449_v38, %v1025_v9 }
 0x28f   : > { %v1372_v11 = vpack.c.bf16 %v1026_v10, %v1024_v47 }
 0x291   : > { %1384 = vst [vmem:[%s1831_s15 + $0x30] sm:$0xff] %v1372_v11  }
 0x294   : > { %v1028_v51 = vpop.f32.mrf.mxu2 }
 0x295   : > { %v1029_v37 = vadd.f32 %v1449_v38, %v1028_v51 }
 0x29c   : > { %v1030_v59 = vpop.f32.mrf.mxu2 }
 0x29d   : > { %v1031_v2 = vadd.f32 %v1449_v38, %v1030_v59 }
 0x29f   : > { %v1377_v12 = vpack.c.bf16 %v1031_v2, %v1029_v37 }
 0x2a1   : > { %1385 = vst [vmem:[%s1831_s15 + $0x38] sm:$0xff] %v1377_v12  }
 0x2a2   : > { %1477 = shalt.err (!%p1474_p3)
}
 0x2a3   : > { %s1514_s8 = smov 64   ;;  %s1515_s15 = smov 4  }
 0x2a4   : > { %1406 = dma.vmem_to_hbm [thread:$0]  (%p1594_p5), %s1079_s20, 1024, %s1081_s22, %s1066_s29, %s1514_s8, %s1514_s8, %s1515_s15  }
 0x2a5 PF: > { %p1412_p4 = scmp.ge.s32.totalorder %s1512_s27, 2  ;;  %s1095_s17 = sand.u32 1, %s1500_s24  }
 0x2a6   : > { %s1096_s18 = scalar_lea.sflag [#allocation3], %s1095_s17 }
 0x2a7   : > { %p1409_p7 = pnand %p1412_p4, %p1598_p6 }
 0x2a9   : > { %p1410_p8 = pneg %p1409_p7 }
 0x2ab   : > { %1495 = dma.done.wait (%p1410_p8), %s1096_s18, 1024  }
 0x2ac   : > { %1497 = vsyncadd (%p1410_p8), %s1096_s18, 4294966272  ;;  %p17_p9 = scmp.ge.s32.totalorder %s1581_s30, 6   ;;  %s1885_s24 = smov %s1504_s25 }
 0x2ad   : > { %s1886_s25 = smov %s1508_s26  ;;  %s1887_s26 = smov %s1592_s10 }
 0x2ae   : > { %s1888_s27 = smov %s1581_s30  ;;  %19 = sbr.rel (!%p17_p9) target bundleno = 3 (0x3), region = 83 }
 0x2b3   :  { %1102 = vsyncpa [#allocation3], 1 }
 0x2b4   :  { %1104 = vsyncpa [#allocation3 + $0x1], 1 }

// kernel: tpu_custom_call.1
= control target key start
LH: loop header
LB: loop body
LE: loop exit
PB: predicated region body
PF: predicated region fallthrough
CT: control target
= control target key end

     0   :  { %12 = vsyncpa [#allocation3], 0  ;;  %s1875_s0 = inlined_call_operand.vmem [shape: f32[512,300], index: 0, kind: input, shape index: {}]   ;;  %s1876_s1 = inlined_call_operand.vmem [shape: bf16[300,128], index: 1, kind: input, shape index: {}]   ;;  %s1877_s2 = inlined_call_operand.vmem [shape: f32[1,128], index: 2, kind: input, shape index: {}]   ;;  %s1878_s3 = inlined_call_operand.vmem [shape: bf16[128,128], index: 3, kind: input, shape index: {}]   ;;  %s1879_s4 = inlined_call_operand.vmem [shape: f32[1,128], index: 4, kind: input, shape index: {}]   ;;  %s1880_s5 = inlined_call_operand.vmem [shape: bf16[128,128], index: 5, kind: input, shape index: {}]   ;;  %s1881_s6 = inlined_call_operand.vmem [shape: f32[1,128], index: 6, kind: input, shape index: {}]   ;;  %s1882_s7 = inlined_call_operand.hbm [shape: bf16[512,128], index: 7, kind: output, shape index: {}]  }
   0x1   :  { %14 = vsyncpa [#allocation3 + $0x1], 0  ;;  %s1556_s24 = smov 0   ;;  %s1558_s25 = smov 0  }
   0x2   :  { %s1560_s26 = smov 0   ;;  %s1562_s27 = smov 0  }
   0x3 LB: > { %s1577_s28 = sadd.s32 4294967295, %s1512_s27   ;;  %s1143_s29 = sadd.s32 4294967294, %s1512_s27   ;;  %s1512_s27 = sphi %s1562_s27, %s1888_s27   ;;  %s1508_s26 = sphi %s1560_s26, %s1887_s26   ;;  %s1504_s25 = sphi %s1558_s25, %s1886_s25   ;;  %s1500_s24 = sphi %s1556_s24, %s1885_s24  }
   0x4   : > { %s1581_s30 = sadd.s32 1, %s1512_s27   ;;  %s179_s8 = sadd.s32 1, %s1508_s26 }
   0x5   : > { %s176_s9 = ssub.s32 %s1512_s27, %s1581_s30  ;;  %p189_p0 = scmp.ne.s32.totalorder %s1508_s26, %s1504_s25 }
   0x6   : > { %p177_p1 = scmp.eq.s32.totalorder %s176_s9, 0  ;;  %p190_p2 = scmp.eq.s32.totalorder %s1577_s28, 3 }
   0x7   : > { %p195_p3 = scmp.ne.s32.totalorder %s1504_s25, %s1500_s24  ;;  %p196_p4 = scmp.eq.s32.totalorder %s1143_s29, 3 }
   0x8   : > { %s1592_s10 = scalar_select %p177_p1, %s1508_s26, %s179_s8  }
   0x9   : > { %p1594_p5 = por %p190_p2, %p189_p0  ;;  %p1598_p6 = por %p196_p4, %p195_p3 }
   0xa   : > { %p1146_p7 = scmp.ge.s32.totalorder %s1512_s27, 1  ;;  %p242_p8 = scmp.lt.s32.totalorder %s1512_s27, 5 }
   0xc   : > { %p243_p9 = pnand %p1146_p7, %p242_p8 }
   0xd   : > { %s1148_s23 = sshll.u32 (!%p243_p9), %s1577_s28, 4  ;;  %s272_s8 = sand.u32 (!%p243_p9), 1, %s1504_s25  }
   0xe   : > { %246 = sbr.rel (%p243_p9) target bundleno = 677 (0x2a5), region = 48  ;;  %p276_p10 = scmp.lt.s32.totalorder (!%p243_p9), %s1148_s23, 63 }
   0xf   : > { %s1147_s14 = sshll.u32 (!%p243_p9), %s272_s8, 6  ;;  %s1066_s29 = scalar_lea.sflag (!%p243_p9), [#allocation3], %s272_s8 }
  0x10   : > { %s1831_s15 = scalar_lea.vmem (!%p243_p9), [#allocation2], %s1147_s14  ;;  %s1470_s13 = scalar_lea.hbm (!%p243_p9), %s1882_s7, 256 }
  0x11   : > { %s1078_s20 = sshll.u32 (!%p243_p9), %s1831_s15, 4  ;;  %s1079_s20 = int_to_ptr.vmem [resolvable:$true] %s1078_s20 }
  0x13   : > { %v1310_v0 = vld [vmem:[%s1876_s1 + $0x38] sm:$0xff]  ;;  %v1309_v1 = vld [vmem:[%s1876_s1 + $0x30] sm:$0xff]  ;;  %vm536_vm0 = vcmask 1045504   ;;  %v1308_v5 = vld [vmem:[%s1876_s1 + $0x28] sm:$0xff]  ;;  %s1890_s23 = smov (!%p276_p10, %s1148_s23), 63  ;;  %vm511_vm1 = vcmask 359424  }
  0x14   : > { %540 = vmatpush.bf16.msra.mxu0 %v1310_v0  ;;  %1386 = vmatpush.bf16.msra.mxu1 %v1310_v0  ;;  %v1224_v2 = vld [vmem:[%s1876_s1 + $0x90] sm:$0xf]  ;;  %v1321_v3 = vld [vmem:[%s1876_s1 + $0x90] sm:$0x30]  ;;  %v1307_v7 = vld [vmem:[%s1876_s1 + $0x20] sm:$0xff]  ;;  %s1405_s16 = smul.u32 24, %s1890_s23 }
  0x15   : > { %1387 = vmatpush.bf16.msra.mxu3 %v1310_v0  ;;  %v1225_v4 = vor.u32 %v1321_v3, %v1224_v2  ;;  %v1306_v8 = vld [vmem:[%s1876_s1 + $0x18] sm:$0xff]  ;;  %v1305_v9 = vld [vmem:[%s1876_s1 + $0x10] sm:$0xff]  ;;  %v1304_v10 = vld [vmem:[%s1876_s1 + $0x8] sm:$0xff] }
  0x16   : > { %s1635_s21 = scalar_lea.vmem %s1875_s0, %s1405_s16  ;;  %v1320_v11 = vld [vmem:[%s1876_s1 + $0x88] sm:$0xff]  ;;  %v1303_v12 = vld [vmem:[%s1876_s1] sm:$0xff]  ;;  %v1318_v17 = vld [vmem:[%s1876_s1 + $0x78] sm:$0xff]  ;;  %s1338_s16 = sshll.u32 %s1577_s28, 6 }
  0x17   : > { %v538_v6 = vsel %vm536_vm0, %v1225_v4, 0  ;;  %v284_v13 = vld [vmem:[%s1635_s21] sm:$0xff]  ;;  %v287_v14 = vld [vmem:[%s1635_s21 + $0x18] sm:$0xff]  ;;  %v314_v15 = vld [vmem:[%s1635_s21 + $0xf0] sm:$0xff]  ;;  %s1077_s19 = scalar_lea.hbm %s1882_s7, %s1338_s16 }
  0x18   : > { %541 = vmatpush.bf16.msra.mxu0 %v1309_v1  ;;  %1388 = vmatpush.bf16.msra.mxu1 %v1309_v1  ;;  %v317_v16 = vld [vmem:[%s1635_s21 + $0x108] sm:$0xff]  ;;  %v332_v18 = vpack.c.bf16 %v287_v14, %v284_v13  ;;  %v1317_v20 = vld [vmem:[%s1876_s1 + $0x70] sm:$0xff]  ;;  %v1315_v22 = vld [vmem:[%s1876_s1 + $0x60] sm:$0xff]  ;;  %s1080_s22 = sshll.u32 %s1077_s19, 4  ;;  %s1081_s22 = int_to_ptr.hbm [resolvable:$true] %s1080_s22 }
  0x19   : > { %1402 = vmatpush.bf16.msra.mxu2 %v538_v6  ;;  %1389 = vmatpush.bf16.msra.mxu3 %v1309_v1  ;;  %v347_v19 = vpack.c.bf16 %v317_v16, %v314_v15  ;;  %v1316_v21 = vld [vmem:[%s1876_s1 + $0x68] sm:$0xff]  ;;  %v290_v23 = vld [vmem:[%s1635_s21 + $0x30] sm:$0xff]  ;;  %v320_v25 = vld [vmem:[%s1635_s21 + $0x120] sm:$0xff] }
  0x1a   : > { %v293_v24 = vld [vmem:[%s1635_s21 + $0x48] sm:$0xff]  ;;  %v323_v26 = vld [vmem:[%s1635_s21 + $0x138] sm:$0xff]  ;;  %v1313_v30 = vld [vmem:[%s1876_s1 + $0x50] sm:$0xff] }
  0x1b   : > { %v1314_v27 = vld [vmem:[%s1876_s1 + $0x58] sm:$0xff]  ;;  %v335_v28 = vpack.c.bf16 %v293_v24, %v290_v23  ;;  %v350_v29 = vpack.c.bf16 %v323_v26, %v320_v25  ;;  %v1319_v31 = vld [vmem:[%s1876_s1 + $0x80] sm:$0xff]  ;;  %v1312_v32 = vld [vmem:[%s1876_s1 + $0x48] sm:$0xff] }
  0x1c   : > { %542 = vmatpush.bf16.msra.mxu0 %v1308_v5  ;;  %1390 = vmatpush.bf16.msra.mxu1 %v1308_v5  ;;  %v1311_v33 = vld [vmem:[%s1876_s1 + $0x40] sm:$0xff]  ;;  %v299_v35 = vld [vmem:[%s1635_s21 + $0x78] sm:$0xff]  ;;  %v285_v36 = vld [vmem:[%s1635_s21 + $0x8] sm:$0xff] }
  0x1d   : > { %1391 = vmatpush.bf16.msra.mxu3 %v1308_v5  ;;  %1403 = vmatpush.bf16.msra.mxu2 %v1320_v11  ;;  %v296_v34 = vld [vmem:[%s1635_s21 + $0x60] sm:$0xff]  ;;  %v302_v40 = vld [vmem:[%s1635_s21 + $0x90] sm:$0xff]  ;;  %v305_v41 = vld [vmem:[%s1635_s21 + $0xa8] sm:$0xff] }
  0x1e   : > { %v288_v37 = vld [vmem:[%s1635_s21 + $0x20] sm:$0xff]  ;;  %v338_v38 = vpack.c.bf16 %v299_v35, %v296_v34  ;;  %v291_v42 = vld [vmem:[%s1635_s21 + $0x38] sm:$0xff]  ;;  %v294_v43 = vld [vmem:[%s1635_s21 + $0x50] sm:$0xff]  ;;  %v341_v44 = vpack.c.bf16 %v305_v41, %v302_v40 }
  0x1f   : > { %v333_v39 = vpack.c.bf16 %v288_v37, %v285_v36  ;;  %v336_v45 = vpack.c.bf16 %v294_v43, %v291_v42  ;;  %v308_v46 = vld [vmem:[%s1635_s21 + $0xc0] sm:$0xff]  ;;  %v311_v47 = vld [vmem:[%s1635_s21 + $0xd8] sm:$0xff]  ;;  %v297_v48 = vld [vmem:[%s1635_s21 + $0x68] sm:$0xff] }
  0x20   : > { %543 = vmatpush.bf16.msra.mxu0 %v1307_v7  ;;  %1392 = vmatpush.bf16.msra.mxu1 %v1307_v7  ;;  %v300_v49 = vld [vmem:[%s1635_s21 + $0x80] sm:$0xff]  ;;  %v344_v50 = vpack.c.bf16 %v311_v47, %v308_v46  ;;  %v319_v53 = vld [vmem:[%s1635_s21 + $0x118] sm:$0xff]  ;;  %v306_v56 = vld [vmem:[%s1635_s21 + $0xb0] sm:$0xff] }
  0x21   : > { %1393 = vmatpush.bf16.msra.mxu3 %v1307_v7  ;;  %1404 = vmatpush.bf16.msra.mxu2 %v1319_v31  ;;  %v339_v51 = vpack.c.bf16 %v300_v49, %v297_v48  ;;  %v316_v52 = vld [vmem:[%s1635_s21 + $0x100] sm:$0xff]  ;;  %v303_v55 = vld [vmem:[%s1635_s21 + $0x98] sm:$0xff]  ;;  %v286_v57 = vld [vmem:[%s1635_s21 + $0x10] sm:$0xff] }
  0x22   : > { %v349_v54 = vpack.c.bf16 %v319_v53, %v316_v52  ;;  %v289_v58 = vld [vmem:[%s1635_s21 + $0x28] sm:$0xff]  ;;  %v342_v59 = vpack.c.bf16 %v306_v56, %v303_v55  ;;  %v322_v61 = vld [vmem:[%s1635_s21 + $0x130] sm:$0xff]  ;;  %v312_v1 = vld [vmem:[%s1635_s21 + $0xe0] sm:$0xff] }
  0x23   : > { %v334_v60 = vpack.c.bf16 %v289_v58, %v286_v57  ;;  %v325_v62 = vld [vmem:[%s1635_s21 + $0x148] sm:$0xff]  ;;  %v292_v2 = vld [vmem:[%s1635_s21 + $0x40] sm:$0xff]  ;;  %v295_v3 = vld [vmem:[%s1635_s21 + $0x58] sm:$0xff] }
  0x24   : > { %544 = vmatpush.bf16.msra.mxu0 %v1306_v8  ;;  %1394 = vmatpush.bf16.msra.mxu1 %v1306_v8  ;;  %v352_v63 = vpack.c.bf16 %v325_v62, %v322_v61  ;;  %v309_v0 = vld [vmem:[%s1635_s21 + $0xc8] sm:$0xff]  ;;  %v337_v5 = vpack.c.bf16 %v295_v3, %v292_v2  ;;  %v318_v7 = vld [vmem:[%s1635_s21 + $0x110] sm:$0xff]  ;;  %v324_v13 = vld [vmem:[%s1635_s21 + $0x140] sm:$0xff] }
  0x25   : > { %1395 = vmatpush.bf16.msra.mxu3 %v1306_v8  ;;  %1231 = vmatmul.msk.bf16.vlgmr.msra.gmra.mxu2 %vm511_vm1, %v349_v54  ;;  %v345_v4 = vpack.c.bf16 %v312_v1, %v309_v0  ;;  %v298_v8 = vld [vmem:[%s1635_s21 + $0x70] sm:$0xff]  ;;  %v304_v14 = vld [vmem:[%s1635_s21 + $0xa0] sm:$0xff]  ;;  %v307_v15 = vld [vmem:[%s1635_s21 + $0xb8] sm:$0xff] }
  0x26   : > { %v313_v23 = vld [vmem:[%s1635_s21 + $0xe8] sm:$0xff]  ;;  %v326_v24 = vld [vmem:[%s1635_s21 + $0x150] sm:$0xff]  ;;  %v1325_v46 = vld [vmem:[%s1878_s3 + $0x18] sm:$0xff] }
  0x27   : > { %v329_v25 = vld [vmem:[%s1635_s21 + $0x168] sm:$0xff]  ;;  %v330_v34 = vld [vmem:[%s1635_s21 + $0x170] sm:$0xff]  ;;  %v1322_v53 = vld [vmem:[%s1878_s3] sm:$0xff] }
  0x28   : > { %545 = vmatpush.bf16.msra.mxu0 %v1305_v9  ;;  %1396 = vmatpush.bf16.msra.mxu1 %v1305_v9  ;;  %v1328_v41 = vld [vmem:[%s1878_s3 + $0x30] sm:$0xff]  ;;  %v1327_v42 = vld [vmem:[%s1878_s3 + $0x28] sm:$0xff]  ;;  %v1769_v58 = vld [vmem:[%s1877_s2] ss:$0 sm:$0xff] }
  0x29   : > { %1397 = vmatpush.bf16.msra.mxu3 %v1305_v9  ;;  %v301_v9 = vld [vmem:[%s1635_s21 + $0x88] sm:$0xff]  ;;  %v1324_v49 = vld [vmem:[%s1878_s3 + $0x10] sm:$0xff] }
  0x2c   : > { %546 = vmatpush.bf16.msra.mxu0 %v1304_v10  ;;  %1398 = vmatpush.bf16.msra.mxu1 %v1304_v10 }
  0x2d   : > { %1399 = vmatpush.bf16.msra.mxu3 %v1304_v10 }
  0x30   : > { %547 = vmatpush.bf16.msra.mxu0 %v1303_v12  ;;  %1400 = vmatpush.bf16.msra.mxu1 %v1303_v12 }
  0x31   : > { %1401 = vmatpush.bf16.msra.mxu3 %v1303_v12  ;;  %v321_v12 = vld [vmem:[%s1635_s21 + $0x128] sm:$0xff] }
  0x32   : > { %v351_v16 = vpack.c.bf16 %v324_v13, %v321_v12 }
  0x33   : > { %548 = vmatmul.bf16.vlgmr.msra.gmra.mxu0 %v332_v18  ;;  %573 = vmatmul.bf16.vlgmr.msra.gmra.mxu1 %v347_v19 }
  0x34   : > { %643 = vmatpush.bf16.msrb.mxu0 %v538_v6  ;;  %589 = vmatpush.bf16.msrb.mxu1 %v1318_v17  ;;  %v315_v6 = vld [vmem:[%s1635_s21 + $0xf8] sm:$0xff]  ;;  %v343_v17 = vpack.c.bf16 %v307_v15, %v304_v14 }
  0x35   : > { %1232 = vmatmul.msk.bf16.gmra.mxu2 %vm511_vm1, %v352_v63  ;;  %v348_v10 = vpack.c.bf16 %v318_v7, %v315_v6 }
  0x38   : > { %590 = vmatpush.bf16.msrb.mxu1 %v1317_v20  ;;  %644 = vmatpush.bf16.msrb.mxu0 %v1320_v11  ;;  %v340_v11 = vpack.c.bf16 %v301_v9, %v298_v8 }
  0x3c   : > { %591 = vmatpush.bf16.msrb.mxu1 %v1316_v21  ;;  %645 = vmatpush.bf16.msrb.mxu0 %v1319_v31  ;;  %v331_v31 = vld [vmem:[%s1635_s21 + $0x178] sm:$0xff] }
  0x40   : > { %592 = vmatpush.bf16.msrb.mxu1 %v1315_v22  ;;  %v310_v22 = vld [vmem:[%s1635_s21 + $0xd0] sm:$0xff] }
  0x41   : > { %v346_v26 = vpack.c.bf16 %v313_v23, %v310_v22 }
  0x43   : > { %553 = vmatmul.bf16.gmra.mxu0 %v335_v28  ;;  %578 = vmatmul.bf16.gmra.mxu1 %v350_v29 }
  0x44   : > { %593 = vmatpush.bf16.msrb.mxu1 %v1314_v27  ;;  %v353_v27 = vpack.c.bf16 %v329_v25, %v326_v24 }
  0x46   : > { %583 = vmatmul.bf16.vlgmr.msra.gmra.mxu3 %v353_v27 }
  0x48   : > { %594 = vmatpush.bf16.msrb.mxu1 %v1313_v30  ;;  %v328_v30 = vld [vmem:[%s1635_s21 + $0x160] sm:$0xff] }
  0x4c   : > { %595 = vmatpush.bf16.msrb.mxu1 %v1312_v32  ;;  %v355_v32 = vpack.c.bf16 %v331_v31, %v328_v30 }
  0x4e   : > { %1233 = vmatmul.msk.bf16.gmra.mxu2 %vm511_vm1, %v355_v32 }
  0x50   : > { %596 = vmatpush.bf16.msrb.mxu1 %v1311_v33  ;;  %v327_v33 = vld [vmem:[%s1635_s21 + $0x158] sm:$0xff]  ;;  %s1464_s21 = sshra.s32 %s1081_s22, 4  ;;  %s1465_s21 = int_to_ptr.hbm [resolvable:$true] %s1464_s21 }
  0x51   : > { %v354_v35 = vpack.c.bf16 %v330_v34, %v327_v33  ;;  %s1466_s23 = scalar_lea.hbm %s1465_s21, 64  ;;  %p1471_p0 = scmp.lt.s32.totalorder %s1465_s21, %s1882_s7 }
  0x52   : > { %p1467_p11 = scmp.ne.s32.totalorder %s1465_s21, %s1466_s23  ;;  %p1472_p1 = scmp.lt.s32.totalorder %s1470_s13, %s1466_s23 }
  0x53   : > { %558 = vmatmul.bf16.gmra.mxu0 %v338_v38  ;;  %597 = vmatmul.bf16.vlgmr.msrb.gmra.mxu1 %v333_v39  ;;  %v1329_v38 = vld [vmem:[%s1878_s3 + $0x38] sm:$0xff] }
  0x54   : > { %811 = vmatpush.bf16.msrb.mxu3 %v1329_v38  ;;  %p1468_p12 = pnand %p1467_p11, %p1594_p5  ;;  %p1473_p2 = por %p1472_p1, %p1471_p0 }
  0x56   : > { %p1469_p13 = pneg %p1468_p12 }
  0x58   : > { %812 = vmatpush.bf16.msrb.mxu3 %v1328_v41  ;;  %p1474_p3 = pnand %p1473_p2, %p1469_p13 }
  0x5c   : > { %813 = vmatpush.bf16.msrb.mxu3 %v1327_v42 }
  0x63   : > { %563 = vmatmul.bf16.gmra.mxu0 %v341_v44  ;;  %602 = vmatmul.bf16.gmra.mxu1 %v336_v45  ;;  %v1326_v45 = vld [vmem:[%s1878_s3 + $0x20] sm:$0xff] }
  0x64   : > { %814 = vmatpush.bf16.msrb.mxu3 %v1326_v45 }
  0x68   : > { %815 = vmatpush.bf16.msrb.mxu3 %v1325_v46 }
  0x6c   : > { %816 = vmatpush.bf16.msrb.mxu3 %v1324_v49 }
  0x73   : > { %568 = vmatmul.bf16.gmra.mxu0 %v344_v50  ;;  %607 = vmatmul.bf16.gmra.mxu1 %v339_v51  ;;  %v1323_v50 = vld [vmem:[%s1878_s3 + $0x8] sm:$0xff] }
  0x74   : > { %817 = vmatpush.bf16.msrb.mxu3 %v1323_v50 }
  0x78   : > { %818 = vmatpush.bf16.msrb.mxu3 %v1322_v53 }
  0x83   : > { %612 = vmatmul.bf16.gmra.mxu1 %v342_v59  ;;  %1226 = vmatmul.msk.bf16.vlgmr.msrb.gmra.mxu0 %vm511_vm1, %v334_v60 }
  0x93   : > { %617 = vmatmul.bf16.gmra.mxu1 %v345_v4  ;;  %1227 = vmatmul.msk.bf16.gmra.mxu0 %vm511_vm1, %v337_v5 }
  0xa3   : > { %622 = vmatmul.bf16.gmra.mxu1 %v348_v10  ;;  %1228 = vmatmul.msk.bf16.gmra.mxu0 %vm511_vm1, %v340_v11 }
  0xb0   : > { %v549_v18 = vpop.f32.mrf.mxu0  ;;  %v1715_v19 = vpop.f32.mrf.mxu1 }
  0xb1   : > { %v550_v61 = vadd.f32 %v1769_v58, %v549_v18  ;;  %v672_v18 = vpop.f32.mrf.mxu2 }
  0xb3   : > { %627 = vmatmul.bf16.gmra.mxu1 %v351_v16  ;;  %1229 = vmatmul.msk.bf16.gmra.mxu0 %vm511_vm1, %v343_v17 }
  0xb8   : > { %v551_v20 = vpop.f32.mrf.mxu0  ;;  %v1718_v21 = vpop.f32.mrf.mxu1 }
  0xb9   : > { %v552_v62 = vadd.f32 %v1769_v58, %v551_v20  ;;  %v577_v33 = vadd.f32 %v1769_v58, %v1718_v21 }
  0xc0   : > { %v554_v28 = vpop.f32.mrf.mxu0  ;;  %v1724_v29 = vpop.f32.mrf.mxu1 }
  0xc1   : > { %v555_v10 = vadd.f32 %v1769_v58, %v554_v28  ;;  %v674_v28 = vpop.f32.mrf.mxu2  ;;  %v580_v21 = vadd.f32 %v1769_v58, %v1724_v29 }
  0xc3   : > { %1230 = vmatmul.msk.bf16.gmra.mxu0 %vm511_vm1, %v346_v26  ;;  %632 = vmatmul.bf16.gmra.mxu1 %v354_v35  ;;  %v575_v26 = vadd.f32 %v1769_v58, %v1715_v19 }
  0xc8   : > { %v556_v36 = vpop.f32.mrf.mxu0  ;;  %v1732_v37 = vpop.f32.mrf.mxu1 }
  0xc9   : > { %v557_v11 = vadd.f32 %v1769_v58, %v556_v36  ;;  %v677_v49 = vpop.f32.mrf.mxu2 }
  0xd0   : > { %v559_v39 = vpop.f32.mrf.mxu0  ;;  %v598_v40 = vpop.f32.mrf.mxu1 }
  0xd1   : > { %v599_v63 = vadd.f32 %v598_v40, %v550_v61  ;;  %v560_v27 = vadd.f32 %v1769_v58, %v559_v39  ;;  %v582_v61 = vadd.f32 %v1769_v58, %v1732_v37 }
  0xd8   : > { %v561_v43 = vpop.f32.mrf.mxu0  ;;  %v600_v44 = vpop.f32.mrf.mxu1 }
  0xd9   : > { %v601_v0 = vadd.f32 %v600_v44, %v552_v62  ;;  %v562_v30 = vadd.f32 %v1769_v58, %v561_v43 }
  0xe0   : > { %v1749_v47 = vpop.f32.mrf.mxu0  ;;  %v603_v48 = vpop.f32.mrf.mxu1 }
  0xe1   : > { %v604_v12 = vadd.f32 %v603_v48, %v555_v10  ;;  %v565_v53 = vadd.f32 %v1769_v58, %v1749_v47 }
  0xe8   : > { %v1757_v51 = vpop.f32.mrf.mxu0  ;;  %v605_v52 = vpop.f32.mrf.mxu1 }
  0xe9   : > { %v606_v13 = vadd.f32 %v605_v52, %v557_v11 }
  0xf0   : > { %v1762_v54 = vpop.f32.mrf.mxu0  ;;  %v608_v55 = vpop.f32.mrf.mxu1 }
  0xf1   : > { %v609_v31 = vadd.f32 %v608_v55, %v560_v27  ;;  %v567_v55 = vadd.f32 %v1769_v58, %v1757_v51  ;;  %v570_v37 = vadd.f32 %v1769_v58, %v1762_v54  ;;  %v1336_v54 = vld [vmem:[%s1880_s5 + $0x30] sm:$0xff] }
  0xf8   : > { %v1764_v56 = vpop.f32.mrf.mxu0  ;;  %v610_v57 = vpop.f32.mrf.mxu1 }
  0xf9   : > { %v611_v34 = vadd.f32 %v610_v57, %v562_v30 }
 0x100   : > { %v613_v59 = vpop.f32.mrf.mxu1  ;;  %v647_v60 = vpop.f32.mrf.mxu0 }
 0x101   : > { %v648_v1 = vadd.f32 %v647_v60, %v599_v63  ;;  %v614_v57 = vadd.f32 %v613_v59, %v565_v53 }
 0x103   : > { %v719_v5 = vmax.f32 %v648_v1, 0.0 }
 0x108   : > { %v615_v2 = vpop.f32.mrf.mxu1  ;;  %v649_v3 = vpop.f32.mrf.mxu0 }
 0x109   : > { %v650_v4 = vadd.f32 %v649_v3, %v601_v0  ;;  %v616_v62 = vadd.f32 %v615_v2, %v567_v55  ;;  %v679_v0 = vpop.f32.mrf.mxu2  ;;  %v572_v2 = vadd.f32 %v1769_v58, %v1764_v56  ;;  %v1335_v56 = vld [vmem:[%s1880_s5 + $0x28] sm:$0xff] }
 0x10b   : > { %v720_v6 = vmax.f32 %v650_v4, 0.0 }
 0x10d   : > { %v735_v7 = vpack.c.bf16 %v720_v6, %v719_v5 }
 0x10f   : > { %819 = vmatmul.bf16.vlgmr.msrb.gmra.mxu3 %v735_v7 }
 0x110   : > { %v1773_v8 = vpop.f32.mrf.mxu1  ;;  %v652_v9 = vpop.f32.mrf.mxu0 }
 0x111   : > { %v653_v14 = vadd.f32 %v652_v9, %v604_v12  ;;  %v619_v12 = vadd.f32 %v1773_v8, %v570_v37  ;;  %v1334_v8 = vld [vmem:[%s1880_s5 + $0x20] sm:$0xff]  ;;  %v682_v27 = vpop.f32.mrf.mxu2 }
 0x113   : > { %v721_v20 = vmax.f32 %v653_v14, 0.0 }
 0x118   : > { %v620_v15 = vpop.f32.mrf.mxu1  ;;  %v654_v16 = vpop.f32.mrf.mxu0 }
 0x119   : > { %v655_v17 = vadd.f32 %v654_v16, %v606_v13  ;;  %v621_v13 = vadd.f32 %v620_v15, %v572_v2  ;;  %v584_v15 = vpop.f32.mrf.mxu3 }
 0x11a   : > { %v585_v30 = vadd.f32 %v1769_v58, %v584_v15 }
 0x11b   : > { %v722_v22 = vmax.f32 %v655_v17, 0.0 }
 0x11d   : > { %v736_v23 = vpack.c.bf16 %v722_v22, %v721_v20 }
 0x11f   : > { %824 = vmatmul.bf16.gmra.mxu3 %v736_v23  ;;  %v1337_v23 = vld [vmem:[%s1880_s5 + $0x38] sm:$0xff] }
 0x120   : > { %v623_v24 = vpop.f32.mrf.mxu1  ;;  %v657_v25 = vpop.f32.mrf.mxu0  ;;  %984 = vmatpush.bf16.msrb.mxu2 %v1337_v23 }
 0x121   : > { %v624_v32 = vadd.f32 %v623_v24, %v575_v26  ;;  %v658_v35 = vadd.f32 %v657_v25, %v609_v31  ;;  %v1333_v24 = vld [vmem:[%s1880_s5 + $0x18] sm:$0xff]  ;;  %v1332_v26 = vld [vmem:[%s1880_s5 + $0x10] sm:$0xff] }
 0x123   : > { %v673_v40 = vadd.f32 %v672_v18, %v624_v32  ;;  %v723_v44 = vmax.f32 %v658_v35, 0.0  ;;  %v684_v35 = vpop.f32.mrf.mxu2 }
 0x124   : > { %985 = vmatpush.bf16.msrb.mxu2 %v1336_v54 }
 0x125   : > { %v729_v46 = vmax.f32 %v673_v40, 0.0  ;;  %v1331_v40 = vld [vmem:[%s1880_s5 + $0x8] sm:$0xff] }
 0x128   : > { %v625_v36 = vpop.f32.mrf.mxu1  ;;  %v659_v38 = vpop.f32.mrf.mxu0  ;;  %986 = vmatpush.bf16.msrb.mxu2 %v1335_v56 }
 0x129   : > { %v626_v41 = vadd.f32 %v625_v36, %v577_v33  ;;  %v660_v42 = vadd.f32 %v659_v38, %v611_v34 }
 0x12b   : > { %v724_v45 = vmax.f32 %v660_v42, 0.0  ;;  %v675_v19 = vadd.f32 %v674_v28, %v626_v41  ;;  %v586_v28 = vpop.f32.mrf.mxu3 }
 0x12c   : > { %987 = vmatpush.bf16.msrb.mxu2 %v1334_v8  ;;  %v587_v31 = vadd.f32 %v1769_v58, %v586_v28 }
 0x12d   : > { %v730_v39 = vmax.f32 %v675_v19, 0.0  ;;  %v737_v48 = vpack.c.bf16 %v724_v45, %v723_v44  ;;  %v1330_v44 = vld [vmem:[%s1880_s5] sm:$0xff] }
 0x12e   : > { %v1448_v19 = vld [vmem:[%s1879_s4] ss:$0 sm:$0xff] }
 0x12f   : > { %829 = vmatmul.bf16.gmra.mxu3 %v737_v48  ;;  %v740_v43 = vpack.c.bf16 %v730_v39, %v729_v46 }
 0x130   : > { %v628_v50 = vpop.f32.mrf.mxu1  ;;  %v662_v52 = vpop.f32.mrf.mxu0  ;;  %988 = vmatpush.bf16.msrb.mxu2 %v1333_v24 }
 0x131   : > { %v629_v60 = vadd.f32 %v628_v50, %v580_v21  ;;  %v663_v63 = vadd.f32 %v662_v52, %v614_v57 }
 0x133   : > { %v678_v4 = vadd.f32 %v677_v49, %v629_v60  ;;  %v725_v29 = vmax.f32 %v663_v63, 0.0 }
 0x134   : > { %989 = vmatpush.bf16.msrb.mxu2 %v1332_v26 }
 0x135   : > { %v731_v47 = vmax.f32 %v678_v4, 0.0 }
 0x138   : > { %v630_v1 = vpop.f32.mrf.mxu1  ;;  %v664_v3 = vpop.f32.mrf.mxu0  ;;  %990 = vmatpush.bf16.msrb.mxu2 %v1331_v40 }
 0x139   : > { %v631_v5 = vadd.f32 %v630_v1, %v582_v61  ;;  %v665_v6 = vadd.f32 %v664_v3, %v616_v62 }
 0x13b   : > { %v726_v7 = vmax.f32 %v665_v6, 0.0  ;;  %v680_v9 = vadd.f32 %v679_v0, %v631_v5 }
 0x13c   : > { %991 = vmatpush.bf16.msrb.mxu2 %v1330_v44 }
 0x13d   : > { %v732_v10 = vmax.f32 %v680_v9, 0.0  ;;  %v738_v11 = vpack.c.bf16 %v726_v7, %v725_v29 }
 0x13f   : > { %834 = vmatmul.bf16.gmra.mxu3 %v738_v11  ;;  %v741_v51 = vpack.c.bf16 %v732_v10, %v731_v47 }
 0x140   : > { %v667_v59 = vpop.f32.mrf.mxu0  ;;  %v633_v25 = vpop.f32.mrf.mxu1 }
 0x141   : > { %v668_v14 = vadd.f32 %v667_v59, %v619_v12  ;;  %v634_v33 = vadd.f32 %v633_v25, %v585_v30 }
 0x143   : > { %v727_v18 = vmax.f32 %v668_v14, 0.0  ;;  %v683_v36 = vadd.f32 %v682_v27, %v634_v33 }
 0x145   : > { %v733_v41 = vmax.f32 %v683_v36, 0.0 }
 0x148   : > { %v669_v16 = vpop.f32.mrf.mxu0  ;;  %v635_v32 = vpop.f32.mrf.mxu1 }
 0x149   : > { %v670_v17 = vadd.f32 %v669_v16, %v621_v13  ;;  %v636_v34 = vadd.f32 %v635_v32, %v587_v31 }
 0x14b   : > { %v728_v20 = vmax.f32 %v670_v17, 0.0  ;;  %v685_v38 = vadd.f32 %v684_v35, %v636_v34 }
 0x14d   : > { %v739_v22 = vpack.c.bf16 %v728_v20, %v727_v18  ;;  %v734_v42 = vmax.f32 %v685_v38, 0.0  ;;  %v1449_v38 = vld [vmem:[%s1881_s6] ss:$0 sm:$0xff] }
 0x14f   : > { %839 = vmatmul.bf16.gmra.mxu3 %v739_v22  ;;  %v742_v45 = vpack.c.bf16 %v734_v42, %v733_v41 }
 0x15f   : > { %844 = vmatmul.bf16.gmra.mxu3 %v740_v43 }
 0x16f   : > { %849 = vmatmul.bf16.gmra.mxu3 %v741_v51 }
 0x17f   : > { %854 = vmatmul.bf16.gmra.mxu3 %v742_v45 }
 0x192   : > { %v820_v58 = vpop.f32.mrf.mxu3 }
 0x193   : > { %v821_v46 = vadd.f32 %v1448_v19, %v820_v58 }
 0x195   : > { %v892_v49 = vmax.f32 %v821_v46, 0.0 }
 0x19a   : > { %v822_v39 = vpop.f32.mrf.mxu3 }
 0x19b   : > { %v823_v48 = vadd.f32 %v1448_v19, %v822_v39 }
 0x19d   : > { %v893_v43 = vmax.f32 %v823_v48, 0.0 }
 0x19f   : > { %v908_v50 = vpack.c.bf16 %v893_v43, %v892_v49 }
 0x1a1   : > { %992 = vmatmul.bf16.vlgmr.msrb.gmra.mxu2 %v908_v50 }
 0x1a2   : > { %v825_v52 = vpop.f32.mrf.mxu3 }
 0x1a3   : > { %v826_v21 = vadd.f32 %v1448_v19, %v825_v52 }
 0x1a5   : > { %v894_v57 = vmax.f32 %v826_v21, 0.0 }
 0x1aa   : > { %v827_v53 = vpop.f32.mrf.mxu3 }
 0x1ab   : > { %v828_v55 = vadd.f32 %v1448_v19, %v827_v53 }
 0x1ad   : > { %v895_v60 = vmax.f32 %v828_v55, 0.0 }
 0x1af   : > { %v909_v61 = vpack.c.bf16 %v895_v60, %v894_v57 }
 0x1b1   : > { %997 = vmatmul.bf16.gmra.mxu2 %v909_v61 }
 0x1b2   : > { %v830_v62 = vpop.f32.mrf.mxu3 }
 0x1b3   : > { %v831_v63 = vadd.f32 %v1448_v19, %v830_v62 }
 0x1b5   : > { %v896_v3 = vmax.f32 %v831_v63, 0.0 }
 0x1ba   : > { %v832_v0 = vpop.f32.mrf.mxu3 }
 0x1bb   : > { %v833_v1 = vadd.f32 %v1448_v19, %v832_v0 }
 0x1bd   : > { %v897_v4 = vmax.f32 %v833_v1, 0.0 }
 0x1bf   : > { %v910_v5 = vpack.c.bf16 %v897_v4, %v896_v3 }
 0x1c1   : > { %1002 = vmatmul.bf16.gmra.mxu2 %v910_v5 }
 0x1c2   : > { %v835_v6 = vpop.f32.mrf.mxu3 }
 0x1c3   : > { %v836_v29 = vadd.f32 %v1448_v19, %v835_v6 }
 0x1c5   : > { %v898_v47 = vmax.f32 %v836_v29, 0.0 }
 0x1ca   : > { %v837_v7 = vpop.f32.mrf.mxu3 }
 0x1cb   : > { %v838_v9 = vadd.f32 %v1448_v19, %v837_v7 }
 0x1cd   : > { %v899_v10 = vmax.f32 %v838_v9, 0.0 }
 0x1cf   : > { %v911_v11 = vpack.c.bf16 %v899_v10, %v898_v47 }
 0x1d1   : > { %1007 = vmatmul.bf16.gmra.mxu2 %v911_v11 }
 0x1d2   : > { %v840_v51 = vpop.f32.mrf.mxu3 }
 0x1d3   : > { %v841_v59 = vadd.f32 %v1448_v19, %v840_v51 }
 0x1d5   : > { %v900_v12 = vmax.f32 %v841_v59, 0.0 }
 0x1da   : > { %v842_v37 = vpop.f32.mrf.mxu3 }
 0x1db   : > { %v843_v2 = vadd.f32 %v1448_v19, %v842_v37 }
 0x1dd   : > { %v901_v13 = vmax.f32 %v843_v2, 0.0 }
 0x1df   : > { %v912_v14 = vpack.c.bf16 %v901_v13, %v900_v12 }
 0x1e1   : > { %1012 = vmatmul.bf16.gmra.mxu2 %v912_v14 }
 0x1e2   : > { %v845_v16 = vpop.f32.mrf.mxu3 }
 0x1e3   : > { %v846_v17 = vadd.f32 %v1448_v19, %v845_v16 }
 0x1e5   : > { %v902_v22 = vmax.f32 %v846_v17, 0.0 }
 0x1ea   : > { %v847_v18 = vpop.f32.mrf.mxu3 }
 0x1eb   : > { %v848_v20 = vadd.f32 %v1448_v19, %v847_v18 }
 0x1ed   : > { %v903_v23 = vmax.f32 %v848_v20, 0.0 }
 0x1ef   : > { %v913_v54 = vpack.c.bf16 %v903_v23, %v902_v22 }
 0x1f1   : > { %1017 = vmatmul.bf16.gmra.mxu2 %v913_v54 }
 0x1f2   : > { %v850_v56 = vpop.f32.mrf.mxu3 }
 0x1f3   : > { %v851_v8 = vadd.f32 %v1448_v19, %v850_v56 }
 0x1f5   : > { %v904_v25 = vmax.f32 %v851_v8, 0.0 }
 0x1fa   : > { %v852_v15 = vpop.f32.mrf.mxu3 }
 0x1fb   : > { %v853_v24 = vadd.f32 %v1448_v19, %v852_v15 }
 0x1fd   : > { %v905_v26 = vmax.f32 %v853_v24, 0.0 }
 0x1ff   : > { %v914_v27 = vpack.c.bf16 %v905_v26, %v904_v25 }
 0x201   : > { %1022 = vmatmul.bf16.gmra.mxu2 %v914_v27 }
 0x202   : > { %v855_v28 = vpop.f32.mrf.mxu3 }
 0x203   : > { %v856_v30 = vadd.f32 %v1448_v19, %v855_v28 }
 0x205   : > { %v906_v33 = vmax.f32 %v856_v30, 0.0 }
 0x20a   : > { %v857_v31 = vpop.f32.mrf.mxu3 }
 0x20b   : > { %v858_v32 = vadd.f32 %v1448_v19, %v857_v31 }
 0x20d   : > { %v907_v34 = vmax.f32 %v858_v32, 0.0 }
 0x20f   : > { %v915_v35 = vpack.c.bf16 %v907_v34, %v906_v33 }
 0x211   : > { %1027 = vmatmul.bf16.gmra.mxu2 %v915_v35 }
 0x224   : > { %v993_v36 = vpop.f32.mrf.mxu2 }
 0x225   : > { %v994_v41 = vadd.f32 %v1449_v38, %v993_v36 }
 0x22c   : > { %v995_v40 = vpop.f32.mrf.mxu2 }
 0x22d   : > { %v996_v42 = vadd.f32 %v1449_v38, %v995_v40 }
 0x22f   : > { %v1342_v44 = vpack.c.bf16 %v996_v42, %v994_v41 }
 0x231   : > { %1343 = vst [vmem:[%s1831_s15] sm:$0xff] %v1342_v44  }
 0x234   : > { %v998_v45 = vpop.f32.mrf.mxu2 }
 0x235   : > { %v999_v19 = vadd.f32 %v1449_v38, %v998_v45 }
 0x23c   : > { %v1000_v58 = vpop.f32.mrf.mxu2 }
 0x23d   : > { %v1001_v46 = vadd.f32 %v1449_v38, %v1000_v58 }
 0x23f   : > { %v1347_v39 = vpack.c.bf16 %v1001_v46, %v999_v19 }
 0x241   : > { %1379 = vst [vmem:[%s1831_s15 + $0x8] sm:$0xff] %v1347_v39  }
 0x244   : > { %v1003_v48 = vpop.f32.mrf.mxu2 }
 0x245   : > { %v1004_v43 = vadd.f32 %v1449_v38, %v1003_v48 }
 0x24c   : > { %v1005_v49 = vpop.f32.mrf.mxu2 }
 0x24d   : > { %v1006_v50 = vadd.f32 %v1449_v38, %v1005_v49 }
 0x24f   : > { %v1352_v52 = vpack.c.bf16 %v1006_v50, %v1004_v43 }
 0x251   : > { %1380 = vst [vmem:[%s1831_s15 + $0x10] sm:$0xff] %v1352_v52  }
 0x254   : > { %v1008_v21 = vpop.f32.mrf.mxu2 }
 0x255   : > { %v1009_v55 = vadd.f32 %v1449_v38, %v1008_v21 }
 0x25c   : > { %v1010_v53 = vpop.f32.mrf.mxu2 }
 0x25d   : > { %v1011_v57 = vadd.f32 %v1449_v38, %v1010_v53 }
 0x25f   : > { %v1357_v60 = vpack.c.bf16 %v1011_v57, %v1009_v55 }
 0x261   : > { %1381 = vst [vmem:[%s1831_s15 + $0x18] sm:$0xff] %v1357_v60  }
 0x264   : > { %v1013_v61 = vpop.f32.mrf.mxu2 }
 0x265   : > { %v1014_v63 = vadd.f32 %v1449_v38, %v1013_v61 }
 0x26c   : > { %v1015_v62 = vpop.f32.mrf.mxu2 }
 0x26d   : > { %v1016_v0 = vadd.f32 %v1449_v38, %v1015_v62 }
 0x26f   : > { %v1362_v1 = vpack.c.bf16 %v1016_v0, %v1014_v63 }
 0x271   : > { %1382 = vst [vmem:[%s1831_s15 + $0x20] sm:$0xff] %v1362_v1  }
 0x274   : > { %v1018_v3 = vpop.f32.mrf.mxu2 }
 0x275   : > { %v1019_v5 = vadd.f32 %v1449_v38, %v1018_v3 }
 0x27c   : > { %v1020_v4 = vpop.f32.mrf.mxu2 }
 0x27d   : > { %v1021_v6 = vadd.f32 %v1449_v38, %v1020_v4 }
 0x27f   : > { %v1367_v29 = vpack.c.bf16 %v1021_v6, %v1019_v5 }
 0x281   : > { %1383 = vst [vmem:[%s1831_s15 + $0x28] sm:$0xff] %v1367_v29  }
 0x284   : > { %v1023_v7 = vpop.f32.mrf.mxu2 }
 0x285   : > { %v1024_v47 = vadd.f32 %v1449_v38, %v1023_v7 }
 0x28c   : > { %v1025_v9 = vpop.f32.mrf.mxu2 }
 0x28d   : > { %v1026_v10 = vadd.f32 %v1449_v38, %v1025_v9 }
 0x28f   : > { %v1372_v11 = vpack.c.bf16 %v1026_v10, %v1024_v47 }
 0x291   : > { %1384 = vst [vmem:[%s1831_s15 + $0x30] sm:$0xff] %v1372_v11  }
 0x294   : > { %v1028_v51 = vpop.f32.mrf.mxu2 }
 0x295   : > { %v1029_v37 = vadd.f32 %v1449_v38, %v1028_v51 }
 0x29c   : > { %v1030_v59 = vpop.f32.mrf.mxu2 }
 0x29d   : > { %v1031_v2 = vadd.f32 %v1449_v38, %v1030_v59 }
 0x29f   : > { %v1377_v12 = vpack.c.bf16 %v1031_v2, %v1029_v37 }
 0x2a1   : > { %1385 = vst [vmem:[%s1831_s15 + $0x38] sm:$0xff] %v1377_v12  }
 0x2a2   : > { %1477 = shalt.err (!%p1474_p3)
}
 0x2a3   : > { %s1514_s8 = smov 64   ;;  %s1515_s15 = smov 4  }
 0x2a4   : > { %1406 = dma.vmem_to_hbm [thread:$0]  (%p1594_p5), %s1079_s20, 1024, %s1081_s22, %s1066_s29, %s1514_s8, %s1514_s8, %s1515_s15  }
 0x2a5 PF: > { %p1412_p4 = scmp.ge.s32.totalorder %s1512_s27, 2  ;;  %s1095_s17 = sand.u32 1, %s1500_s24  }
 0x2a6   : > { %s1096_s18 = scalar_lea.sflag [#allocation3], %s1095_s17 }
 0x2a7   : > { %p1409_p7 = pnand %p1412_p4, %p1598_p6 }
 0x2a9   : > { %p1410_p8 = pneg %p1409_p7 }
 0x2ab   : > { %1495 = dma.done.wait (%p1410_p8), %s1096_s18, 1024  }
 0x2ac   : > { %1497 = vsyncadd (%p1410_p8), %s1096_s18, 4294966272  ;;  %p17_p9 = scmp.ge.s32.totalorder %s1581_s30, 6   ;;  %s1885_s24 = smov %s1504_s25 }
 0x2ad   : > { %s1886_s25 = smov %s1508_s26  ;;  %s1887_s26 = smov %s1592_s10 }
 0x2ae   : > { %s1888_s27 = smov %s1581_s30  ;;  %19 = sbr.rel (!%p17_p9) target bundleno = 3 (0x3), region = 83 }
 0x2b3   :  { %1102 = vsyncpa [#allocation3], 1 }
 0x2b4   :  { %1104 = vsyncpa [#allocation3 + $0x1], 1 }

</bundles_post_ra>
